<compile_context>
chip_gen: v5e
topology: v5e:2x2
jax: 0.10.0
libtpu: 0.0.40
codegen_flags: <defaults>
</compile_context>

<pallas_src>
import jax
import jax.numpy as jnp
from jax.experimental import pallas as pl
from jax.experimental.pallas import tpu as pltpu


def _shift_lanes(xf, d):
    """result[:, i] = xf[:, i + d] if 0 <= i + d < HW else 0 (d is static)."""
    n = xf.shape[1]
    if d == 0:
        return xf
    pad = jnp.zeros((xf.shape[0], abs(d)), xf.dtype)
    if d > 0:
        return jnp.concatenate([xf[:, d:], pad], axis=1)
    return jnp.concatenate([pad, xf[:, :n + d]], axis=1)


def _num_tensorcores():
    """Best-effort TensorCores-per-chip (v7x = 2, v5e/v6e = 1)."""
    try:
        info = pltpu.get_tpu_info()
        for name in ("num_cores", "num_cores_per_chip", "core_count",
                     "num_tensorcores", "cores_per_chip"):
            v = getattr(info, name, None)
            if isinstance(v, int) and v > 0:
                return v
    except Exception:
        pass
    return 1


def _pick_bg_tile(bg, cg, num_cores=1, target_m=256):
    """Rows-per-grid-step heuristic (perf review):
      * m = bg_tile*cg should approach the MXU width (~128 v5e / ~256 v6e,v7x)
        but not exceed it (block-diagonal zero-FLOP waste beyond that).
      * single-TC chips (v5e/v6e): the grid is a serial loop -> prefer grid=1.
      * multi-TC chips (v7x): prefer an even grid >= 2 (balanced cores).
      * grid > 1 requires m % 8 == 0 (sublane tiling of the (m, hw) blocks).
    """
    best_t, best_key = bg, None
    for t in range(1, bg + 1):
        if bg % t:
            continue
        m, grid = t * cg, bg // t
        if grid > 1 and m % 8:
            continue                                  # illegal (8,128) tiling
        fits = m <= max(target_m, cg)
        if num_cores > 1:
            balanced = grid >= num_cores and grid % num_cores == 0
        else:
            balanced = grid == 1
        key = (fits, balanced, m)
        if best_key is None or key > best_key:
            best_t, best_key = t, key
    return best_t


def build_ema(params, groups, x_shape, dtype=jnp.float32,
              bg_tile=None, target_m=256):
    """Precompute all constant operators once and return a jitted fn(x)."""
    w1, b1, w3, b3, gnw, gnb = params
    b, c, h, w = x_shape
    cg = c // groups
    bg = b * groups
    hw = h * w
    f32 = jnp.float32

    if bg_tile is None:
        bg_tile = _pick_bg_tile(bg, cg, _num_tensorcores(), target_m)
    grid = bg // bg_tile
    m = bg_tile * cg
    # TODO(synk): for general H,W with H*W not a multiple of 128 the output
    # blocks become lane-masked; correctness holds but perf drops.

    # ---- constant operators, built ONCE (hoisted out of the per-call path) --
    eh = jnp.kron(jnp.eye(h, dtype=f32), jnp.ones((1, w), f32))      # (h, hw)
    ew = jnp.kron(jnp.ones((1, h), f32), jnp.eye(w, dtype=f32))      # (w, hw)
    pool_op = jnp.concatenate([eh.T / w, ew.T / h], axis=1)          # (hw, h+w)
    bcast_op = jnp.concatenate([eh, ew], axis=0)                     # (h+w, hw)

    ident = jnp.eye(bg_tile, dtype=f32)
    w1bd = jnp.kron(ident, w1.astype(f32))                           # (m, m)
    w3bd = jnp.concatenate(
        [jnp.kron(ident, w3[:, :, kh, kw].astype(f32))
         for kh in range(3) for kw in range(3)],
        axis=1).astype(jnp.bfloat16)                                 # (m, 9m)
    gmat = jnp.kron(ident, jnp.ones((cg, cg), f32))                  # (m, m)
    vec = jnp.stack([jnp.tile(v.astype(f32), bg_tile)
                     for v in (b1, b3, gnw, gnb)], axis=1)           # (m, 4)

    # ---- explicit VMEM budget: staged im2col + double-buffered blocks -------
    est = 2 * (2 * m * hw * 4                       # x block + out block
               + hw * (h + w) * 4 + (h + w) * hw * 4
               + 2 * m * m * 4                      # w1bd + gmat
               + m * 9 * m * 2                      # w3bd (bf16)
               + m * 128 * 4)                       # vec (lane-padded)
    est += 9 * m * hw * 2                           # im2col scratch (bf16)
    est += 6 * m * hw * 4                           # live f32 intermediates
    vmem_limit = int(min(max(2 * est, 32 << 20), 64 << 20))

    inv_hw = 1.0 / float(hw)
    inv_cg = 1.0 / float(cg)

    def kernel(x_ref, pool_ref, bcast_ref, w1_ref, w3_ref, vec_ref, gm_ref,
               out_ref, im2col_ref):
        xf = x_ref[...].astype(f32)                              # (m, hw)

        vec_v = vec_ref[...]                                     # (m, 4)
        b1v, b3v = vec_v[:, 0:1], vec_v[:, 1:2]
        gnwv, gnbv = vec_v[:, 2:3], vec_v[:, 3:4]

        # --- directional pools + 1x1 conv, fused (DEFAULT precision) --------
        pooled = jnp.dot(xf, pool_ref[...],
                         preferred_element_type=f32)             # (m, h+w)
        feat = jnp.dot(w1_ref[...], pooled,
                       preferred_element_type=f32) + b1v         # (m, h+w)
        gates = jax.nn.sigmoid(feat)
        gate = (jnp.dot(gates[:, :h], bcast_ref[:h, :], preferred_element_type=f32)
                * jnp.dot(gates[:, h:], bcast_ref[h:, :], preferred_element_type=f32))
        t = xf * gate                                            # (m, hw)

        # --- GroupNorm(num_groups == channels): single-pass per-row stats ---
        mu = jnp.sum(t, axis=1, keepdims=True) * inv_hw
        ex2 = jnp.sum(t * t, axis=1, keepdims=True) * inv_hw
        var = jnp.maximum(ex2 - mu * mu, 0.0)
        x1 = (t - mu) * jax.lax.rsqrt(var + 1e-5) * gnwv + gnbv

        # --- conv3x3: stage 9 lane-shifted taps into bf16 im2col scratch,
        #     then ONE (m, 9m) x (9m, hw) bf16 MXU dot with f32 accumulation --
        col = jax.lax.broadcasted_iota(jnp.int32, (1, hw), 1) % w
        left_ok = (col >= 1).astype(f32)
        right_ok = (col <= w - 2).astype(f32)
        for kh in range(3):
            for kw in range(3):
                d = (kh - 1) * w + (kw - 1)
                tap = _shift_lanes(xf, d)            # zero fill handles rows
                if kw == 0:                          # column padding via mask
                    tap = tap * left_ok
                elif kw == 2:
                    tap = tap * right_ok
                ti = kh * 3 + kw
                im2col_ref[ti * m:(ti + 1) * m, :] = tap.astype(jnp.bfloat16)
        x2 = jnp.dot(w3_ref[...], im2col_ref[...],
                     preferred_element_type=f32) + b3v           # (m, hw)

        # --- per-channel spatial means -> per-group channel softmax ---------
        gm = gm_ref[...]                             # (m, m) same-group 0/1
        m12 = jnp.concatenate(
            [jnp.sum(x1, axis=1, keepdims=True),
             jnp.sum(x2, axis=1, keepdims=True)], axis=1) * inv_hw   # (m, 2)
        # Center with the per-group mean (identical constant within a group ->
        # exact softmax; denominator >= 1, so no 0/0 NaN for far-apart groups).
        ctr = jnp.dot(gm, m12, preferred_element_type=f32) * inv_cg
        e12 = jnp.exp(m12 - ctr)
        den = jnp.dot(gm, e12, preferred_element_type=f32)            # (m, 2)
        s12 = e12 / den
        s1, s2 = s12[:, 0:1], s12[:, 1:2]

        # wmap[row, :] = sum over the row's group of (s1 * x2 + s2 * x1)
        wmap = jnp.dot(gm, s1 * x2 + s2 * x1, preferred_element_type=f32)
        out_ref[...] = (xf * jax.nn.sigmoid(wmap)).astype(out_ref.dtype)

    const = lambda i: (0, 0)
    call = pl.pallas_call(
        kernel,
        out_shape=jax.ShapeDtypeStruct((bg * cg, hw), dtype),
        grid_spec=pltpu.PrefetchScalarGridSpec(
            num_scalar_prefetch=0,
            grid=(grid,),
            in_specs=[
                pl.BlockSpec((m, hw), lambda i: (i, 0)),      # activations
                pl.BlockSpec((hw, h + w), const),             # fused pool op
                pl.BlockSpec((h + w, hw), const),             # fused broadcast op
                pl.BlockSpec((m, m), const),                  # conv1x1 (block-diag)
                pl.BlockSpec((m, 9 * m), const),              # conv3x3 (block-diag, bf16)
                pl.BlockSpec((m, 4), const),                  # b1|b3|gnw|gnb packed
                pl.BlockSpec((m, m), const),                  # group indicator
            ],
            out_specs=pl.BlockSpec((m, hw), lambda i: (i, 0)),
            scratch_shapes=[pltpu.VMEM((9 * m, hw), jnp.bfloat16)],
        ),
        compiler_params=pltpu.CompilerParams(
            dimension_semantics=("parallel",),
            vmem_limit_bytes=vmem_limit),
    )

    @jax.jit
    def ema_fn(x):
        xf = x.reshape(bg * cg, hw)                  # lane-dense (rows, H*W)
        out = call(xf, pool_op, bcast_op, w1bd, w3bd, vec, gmat)
        return out.reshape(b, c, h, w)

    return ema_fn


def ema_ref(x, params, groups):
    """Pure-JAX reference mirroring the PyTorch forward, for validation."""
    w1, b1, w3, b3, gnw, gnb = params
    b, c, h, w = x.shape
    cg = c // groups
    gx = x.reshape(b * groups, cg, h, w)
    x_h = gx.mean(axis=3)
    x_w = gx.mean(axis=2)
    xh = jnp.einsum('oc,bch->boh', w1, x_h, precision='highest') + b1[None, :, None]
    xw = jnp.einsum('oc,bcw->bow', w1, x_w, precision='highest') + b1[None, :, None]
    t = gx * jax.nn.sigmoid(xh)[:, :, :, None] * jax.nn.sigmoid(xw)[:, :, None, :]
    mu = t.mean(axis=(2, 3), keepdims=True)
    var = ((t - mu) ** 2).mean(axis=(2, 3), keepdims=True)
    x1 = (t - mu) / jnp.sqrt(var + 1e-5)
    x1 = x1 * gnw[None, :, None, None] + gnb[None, :, None, None]
    xp = jnp.pad(gx, ((0, 0), (0, 0), (1, 1), (1, 1)))
    x2 = jnp.zeros_like(gx) + b3[None, :, None, None]
    for kh in range(3):
        for kw in range(3):
            x2 = x2 + jnp.einsum('oc,bchw->bohw', w3[:, :, kh, kw],
                                 xp[:, :, kh:kh + h, kw:kw + w],
                                 precision='highest')
    s1 = jax.nn.softmax(x1.mean(axis=(2, 3)), axis=-1)
    s2 = jax.nn.softmax(x2.mean(axis=(2, 3)), axis=-1)
    wmap = (jnp.einsum('bc,bchw->bhw', s1, x2, precision='highest')
            + jnp.einsum('bc,bchw->bhw', s2, x1, precision='highest'))
    out = gx * jax.nn.sigmoid(wmap)[:, None, :, :]
    return out.reshape(b, c, h, w)


if __name__ == "__main__":
    key = jax.random.PRNGKey(0)
    B, C, H, W = 2, 16, 16, 16
    FACTOR = 4                       # groups; C // FACTOR = 4 channels per group
    CG = C // FACTOR

    k1, k2, k3, k4, k5 = jax.random.split(key, 5)
    x = jax.random.normal(k1, (B, C, H, W), jnp.float32)

    # Deterministic synthetic parameters (conv1x1, conv3x3, GroupNorm affine)
    w1 = jax.random.normal(k2, (CG, CG), jnp.float32) * 0.3
    b1 = jax.random.normal(k3, (CG,), jnp.float32) * 0.1
    w3 = jax.random.normal(k4, (CG, CG, 3, 3), jnp.float32) * 0.2
    b3 = jax.random.normal(k5, (CG,), jnp.float32) * 0.1
    gnw = jnp.ones((CG,), jnp.float32)
    gnb = jnp.zeros((CG,), jnp.float32)
    params = (w1, b1, w3, b3, gnw, gnb)

    ema_fn = build_ema(params, FACTOR, (B, C, H, W))
    out = jax.block_until_ready(ema_fn(x))

    ref = ema_ref(x, params, FACTOR)
    assert out.shape == (B, C, H, W)
    max_err = float(jnp.max(jnp.abs(out - ref)))
    # Tolerance deliberately relaxed vs the old HIGHEST-precision baseline
    # (5e-4): the conv3x3 now runs as a single bf16 MXU pass and the other
    # dots at DEFAULT precision (per the perf review), which costs ~1e-3..1e-2
    # absolute error on unit-scale activations.
    assert max_err < 3e-2, f"mismatch: {max_err}"

    print("KERNEL_OK")
</pallas_src>

<mosaic_0001>
module attributes {stable_mosaic.version = 11 : i64} {
  func.func @kernel(%arg0: i32, %arg1: memref<32x256xf32, #tpu.memory_space<vmem>>, %arg2: memref<256x32xf32, #tpu.memory_space<vmem>>, %arg3: memref<32x256xf32, #tpu.memory_space<vmem>>, %arg4: memref<32x32xf32, #tpu.memory_space<vmem>>, %arg5: memref<32x288xbf16, #tpu.memory_space<vmem>>, %arg6: memref<32x4xf32, #tpu.memory_space<vmem>>, %arg7: memref<32x32xf32, #tpu.memory_space<vmem>>, %arg8: memref<32x256xf32, #tpu.memory_space<vmem>>, %arg9: memref<288x256xbf16, #tpu.memory_space<vmem>>) attributes {dimension_semantics = [#tpu.dimension_semantics<parallel>], iteration_bounds = array<i64: 1>, scalar_prefetch = 0 : i64, scratch_operands = 1 : i64, tpu.core_type = #tpu.core_type<tc>, window_params = [{transform_indices = @transform_0, window_bounds = array<i64: 32, 256>}, {pipeline_mode = #tpu.pipeline_mode<synchronous>, transform_indices = @transform_1, window_bounds = array<i64: 256, 32>}, {pipeline_mode = #tpu.pipeline_mode<synchronous>, transform_indices = @transform_2, window_bounds = array<i64: 32, 256>}, {pipeline_mode = #tpu.pipeline_mode<synchronous>, transform_indices = @transform_3, window_bounds = array<i64: 32, 32>}, {pipeline_mode = #tpu.pipeline_mode<synchronous>, transform_indices = @transform_4, window_bounds = array<i64: 32, 288>}, {pipeline_mode = #tpu.pipeline_mode<synchronous>, transform_indices = @transform_5, window_bounds = array<i64: 32, 4>}, {pipeline_mode = #tpu.pipeline_mode<synchronous>, transform_indices = @transform_6, window_bounds = array<i64: 32, 32>}, {transform_indices = @transform_7, window_bounds = array<i64: 32, 256>}]} {
    %c0 = arith.constant 0 : index
    %c0_0 = arith.constant 0 : index
    %0 = vector.load %arg1[%c0, %c0_0] : memref<32x256xf32, #tpu.memory_space<vmem>>, vector<32x256xf32>
    %c0_1 = arith.constant 0 : index
    %c0_2 = arith.constant 0 : index
    %1 = vector.load %arg6[%c0_1, %c0_2] : memref<32x4xf32, #tpu.memory_space<vmem>>, vector<32x4xf32>
    %2 = vector.extract_strided_slice %1 {offsets = [0, 0], sizes = [32, 1], strides = [1, 1]} : vector<32x4xf32> to vector<32x1xf32>
    %3 = vector.extract_strided_slice %1 {offsets = [0, 1], sizes = [32, 1], strides = [1, 1]} : vector<32x4xf32> to vector<32x1xf32>
    %4 = vector.extract_strided_slice %1 {offsets = [0, 2], sizes = [32, 1], strides = [1, 1]} : vector<32x4xf32> to vector<32x1xf32>
    %5 = vector.extract_strided_slice %1 {offsets = [0, 3], sizes = [32, 1], strides = [1, 1]} : vector<32x4xf32> to vector<32x1xf32>
    %c0_3 = arith.constant 0 : index
    %c0_4 = arith.constant 0 : index
    %6 = vector.load %arg2[%c0_3, %c0_4] : memref<256x32xf32, #tpu.memory_space<vmem>>, vector<256x32xf32>
    %cst = arith.constant dense<0.000000e+00> : vector<32x32xf32>
    %7 = tpu.matmul %0, %6, %cst {dimension_numbers = #tpu.dot_dimension_numbers<[1], [0], [0], [1], [0, 0, 1, 1], [], []>} : vector<32x256xf32>, vector<256x32xf32>, vector<32x32xf32> -> vector<32x32xf32>
    %c0_5 = arith.constant 0 : index
    %c0_6 = arith.constant 0 : index
    %8 = vector.load %arg4[%c0_5, %c0_6] : memref<32x32xf32, #tpu.memory_space<vmem>>, vector<32x32xf32>
    %cst_7 = arith.constant dense<0.000000e+00> : vector<32x32xf32>
    %9 = tpu.matmul %8, %7, %cst_7 {dimension_numbers = #tpu.dot_dimension_numbers<[1], [0], [0], [1], [0, 0, 1, 1], [], []>} : vector<32x32xf32>, vector<32x32xf32>, vector<32x32xf32> -> vector<32x32xf32>
    %10 = vector.broadcast %2 : vector<32x1xf32> to vector<32x32xf32>
    %11 = arith.addf %9, %10 : vector<32x32xf32>
    %12 = arith.negf %11 : vector<32x32xf32>
    %13 = math.exp %12 : vector<32x32xf32>
    %cst_8 = arith.constant 1.000000e+00 : f32
    %14 = vector.broadcast %cst_8 : f32 to vector<32x32xf32>
    %15 = arith.addf %14, %13 : vector<32x32xf32>
    %16 = arith.divf %14, %15 : vector<32x32xf32>
    %17 = vector.extract_strided_slice %16 {offsets = [0, 0], sizes = [32, 16], strides = [1, 1]} : vector<32x32xf32> to vector<32x16xf32>
    %c0_9 = arith.constant 0 : index
    %c0_10 = arith.constant 0 : index
    %18 = vector.load %arg3[%c0_9, %c0_10] : memref<32x256xf32, #tpu.memory_space<vmem>>, vector<16x256xf32>
    %cst_11 = arith.constant dense<0.000000e+00> : vector<32x256xf32>
    %19 = tpu.matmul %17, %18, %cst_11 {dimension_numbers = #tpu.dot_dimension_numbers<[1], [0], [0], [1], [0, 0, 1, 1], [], []>} : vector<32x16xf32>, vector<16x256xf32>, vector<32x256xf32> -> vector<32x256xf32>
    %20 = vector.extract_strided_slice %16 {offsets = [0, 16], sizes = [32, 16], strides = [1, 1]} : vector<32x32xf32> to vector<32x16xf32>
    %c16 = arith.constant 16 : index
    %c0_12 = arith.constant 0 : index
    %21 = vector.load %arg3[%c16, %c0_12] : memref<32x256xf32, #tpu.memory_space<vmem>>, vector<16x256xf32>
    %cst_13 = arith.constant dense<0.000000e+00> : vector<32x256xf32>
    %22 = tpu.matmul %20, %21, %cst_13 {dimension_numbers = #tpu.dot_dimension_numbers<[1], [0], [0], [1], [0, 0, 1, 1], [], []>} : vector<32x16xf32>, vector<16x256xf32>, vector<32x256xf32> -> vector<32x256xf32>
    %23 = arith.mulf %19, %22 : vector<32x256xf32>
    %24 = arith.mulf %0, %23 : vector<32x256xf32>
    %cst_14 = arith.constant dense<0.000000e+00> : vector<32xf32>
    %25 = vector.multi_reduction <add>, %24, %cst_14 [1] : vector<32x256xf32> to vector<32xf32>
    %26 = vector.shape_cast %25 : vector<32xf32> to vector<32x1xf32>
    %cst_15 = arith.constant 3.906250e-03 : f32
    %27 = vector.broadcast %cst_15 : f32 to vector<32x1xf32>
    %28 = arith.mulf %26, %27 : vector<32x1xf32>
    %29 = arith.mulf %24, %24 : vector<32x256xf32>
    %cst_16 = arith.constant dense<0.000000e+00> : vector<32xf32>
    %30 = vector.multi_reduction <add>, %29, %cst_16 [1] : vector<32x256xf32> to vector<32xf32>
    %31 = vector.shape_cast %30 : vector<32xf32> to vector<32x1xf32>
    %cst_17 = arith.constant 3.906250e-03 : f32
    %32 = vector.broadcast %cst_17 : f32 to vector<32x1xf32>
    %33 = arith.mulf %31, %32 : vector<32x1xf32>
    %34 = arith.mulf %28, %28 : vector<32x1xf32>
    %35 = arith.subf %33, %34 : vector<32x1xf32>
    %cst_18 = arith.constant 0.000000e+00 : f32
    %36 = vector.broadcast %cst_18 : f32 to vector<32x1xf32>
    %37 = arith.maximumf %35, %36 : vector<32x1xf32>
    %38 = vector.broadcast %28 : vector<32x1xf32> to vector<32x256xf32>
    %39 = arith.subf %24, %38 : vector<32x256xf32>
    %cst_19 = arith.constant 9.99999974E-6 : f32
    %40 = vector.broadcast %cst_19 : f32 to vector<32x1xf32>
    %41 = arith.addf %37, %40 : vector<32x1xf32>
    %42 = math.rsqrt %41 : vector<32x1xf32>
    %43 = vector.broadcast %42 : vector<32x1xf32> to vector<32x256xf32>
    %44 = arith.mulf %39, %43 : vector<32x256xf32>
    %45 = vector.broadcast %4 : vector<32x1xf32> to vector<32x256xf32>
    %46 = arith.mulf %44, %45 : vector<32x256xf32>
    %47 = vector.broadcast %5 : vector<32x1xf32> to vector<32x256xf32>
    %48 = arith.addf %46, %47 : vector<32x256xf32>
    %49 = tpu.iota {dimensions = array<i32: 1>} : vector<1x256xi32>
    %c16_i32 = arith.constant 16 : i32
    %c0_i32 = arith.constant 0 : i32
    %50 = arith.cmpi eq, %c16_i32, %c0_i32 : i32
    %c1_i32 = arith.constant 1 : i32
    %51 = arith.select %50, %c1_i32, %c16_i32 : i32
    %52 = vector.broadcast %51 : i32 to vector<1x256xi32>
    %53 = arith.remsi %49, %52 : vector<1x256xi32>
    %c0_i32_20 = arith.constant 0 : i32
    %54 = vector.broadcast %c0_i32_20 : i32 to vector<1x256xi32>
    %55 = arith.cmpi ne, %53, %54 : vector<1x256xi32>
    %c0_i32_21 = arith.constant 0 : i32
    %56 = vector.broadcast %c0_i32_21 : i32 to vector<1x256xi32>
    %57 = arith.cmpi slt, %53, %56 : vector<1x256xi32>
    %c0_i32_22 = arith.constant 0 : i32
    %58 = arith.cmpi slt, %51, %c0_i32_22 : i32
    %59 = vector.broadcast %58 : i1 to vector<1x256xi1>
    %60 = vector.broadcast %59 : vector<1x256xi1> to vector<1x256xi1>
    %61 = arith.xori %57, %60 : vector<1x256xi1>
    %62 = arith.andi %61, %55 : vector<1x256xi1>
    %63 = vector.broadcast %51 : i32 to vector<1x256xi32>
    %64 = arith.addi %53, %63 : vector<1x256xi32>
    %65 = arith.select %62, %64, %53 : vector<1x256xi1>, vector<1x256xi32>
    %c1_i32_23 = arith.constant 1 : i32
    %66 = vector.broadcast %c1_i32_23 : i32 to vector<1x256xi32>
    %67 = arith.cmpi sge, %65, %66 : vector<1x256xi32>
    %68 = arith.extui %67 : vector<1x256xi1> to vector<1x256xi32>
    %69 = arith.sitofp %68 : vector<1x256xi32> to vector<1x256xf32>
    %c14_i32 = arith.constant 14 : i32
    %70 = vector.broadcast %c14_i32 : i32 to vector<1x256xi32>
    %71 = arith.cmpi sle, %65, %70 : vector<1x256xi32>
    %72 = arith.extui %71 : vector<1x256xi1> to vector<1x256xi32>
    %73 = arith.sitofp %72 : vector<1x256xi32> to vector<1x256xf32>
    %cst_24 = arith.constant 0.000000e+00 : f32
    %74 = vector.broadcast %cst_24 : f32 to vector<32x17xf32>
    %75 = vector.extract_strided_slice %0 {offsets = [0, 0], sizes = [32, 239], strides = [1, 1]} : vector<32x256xf32> to vector<32x239xf32>
    %76 = tpu.concatenate %74, %75 in 1 : vector<32x17xf32>, vector<32x239xf32> -> vector<32x256xf32>
    %77 = vector.broadcast %69 : vector<1x256xf32> to vector<32x256xf32>
    %78 = arith.mulf %76, %77 : vector<32x256xf32>
    %79 = arith.truncf %78 : vector<32x256xf32> to vector<32x256xbf16>
    %c0_25 = arith.constant 0 : index
    %c0_26 = arith.constant 0 : index
    %80 = vector.load %arg9[%c0_25, %c0_26] : memref<288x256xbf16, #tpu.memory_space<vmem>>, vector<32x256xbf16>
    tpu.vector_store %arg9[%c0_25, %c0_26], %79 {strides = array<i32>} : memref<288x256xbf16, #tpu.memory_space<vmem>>, vector<32x256xbf16>,
    %cst_27 = arith.constant 0.000000e+00 : f32
    %81 = vector.broadcast %cst_27 : f32 to vector<32x16xf32>
    %82 = vector.extract_strided_slice %0 {offsets = [0, 0], sizes = [32, 240], strides = [1, 1]} : vector<32x256xf32> to vector<32x240xf32>
    %83 = tpu.concatenate %81, %82 in 1 : vector<32x16xf32>, vector<32x240xf32> -> vector<32x256xf32>
    %84 = arith.truncf %83 : vector<32x256xf32> to vector<32x256xbf16>
    %c32 = arith.constant 32 : index
    %c0_28 = arith.constant 0 : index
    %85 = vector.load %arg9[%c32, %c0_28] : memref<288x256xbf16, #tpu.memory_space<vmem>>, vector<32x256xbf16>
    tpu.vector_store %arg9[%c32, %c0_28], %84 {strides = array<i32>} : memref<288x256xbf16, #tpu.memory_space<vmem>>, vector<32x256xbf16>,
    %cst_29 = arith.constant 0.000000e+00 : f32
    %86 = vector.broadcast %cst_29 : f32 to vector<32x15xf32>
    %87 = vector.extract_strided_slice %0 {offsets = [0, 0], sizes = [32, 241], strides = [1, 1]} : vector<32x256xf32> to vector<32x241xf32>
    %88 = tpu.concatenate %86, %87 in 1 : vector<32x15xf32>, vector<32x241xf32> -> vector<32x256xf32>
    %89 = vector.broadcast %73 : vector<1x256xf32> to vector<32x256xf32>
    %90 = arith.mulf %88, %89 : vector<32x256xf32>
    %91 = arith.truncf %90 : vector<32x256xf32> to vector<32x256xbf16>
    %c64 = arith.constant 64 : index
    %c0_30 = arith.constant 0 : index
    %92 = vector.load %arg9[%c64, %c0_30] : memref<288x256xbf16, #tpu.memory_space<vmem>>, vector<32x256xbf16>
    tpu.vector_store %arg9[%c64, %c0_30], %91 {strides = array<i32>} : memref<288x256xbf16, #tpu.memory_space<vmem>>, vector<32x256xbf16>,
    %cst_31 = arith.constant 0.000000e+00 : f32
    %93 = vector.broadcast %cst_31 : f32 to vector<32x1xf32>
    %94 = vector.extract_strided_slice %0 {offsets = [0, 0], sizes = [32, 255], strides = [1, 1]} : vector<32x256xf32> to vector<32x255xf32>
    %95 = tpu.concatenate %93, %94 in 1 : vector<32x1xf32>, vector<32x255xf32> -> vector<32x256xf32>
    %96 = vector.broadcast %69 : vector<1x256xf32> to vector<32x256xf32>
    %97 = arith.mulf %95, %96 : vector<32x256xf32>
    %98 = arith.truncf %97 : vector<32x256xf32> to vector<32x256xbf16>
    %c96 = arith.constant 96 : index
    %c0_32 = arith.constant 0 : index
    %99 = vector.load %arg9[%c96, %c0_32] : memref<288x256xbf16, #tpu.memory_space<vmem>>, vector<32x256xbf16>
    tpu.vector_store %arg9[%c96, %c0_32], %98 {strides = array<i32>} : memref<288x256xbf16, #tpu.memory_space<vmem>>, vector<32x256xbf16>,
    %100 = arith.truncf %0 : vector<32x256xf32> to vector<32x256xbf16>
    %c128 = arith.constant 128 : index
    %c0_33 = arith.constant 0 : index
    %101 = vector.load %arg9[%c128, %c0_33] : memref<288x256xbf16, #tpu.memory_space<vmem>>, vector<32x256xbf16>
    tpu.vector_store %arg9[%c128, %c0_33], %100 {strides = array<i32>} : memref<288x256xbf16, #tpu.memory_space<vmem>>, vector<32x256xbf16>,
    %cst_34 = arith.constant 0.000000e+00 : f32
    %102 = vector.broadcast %cst_34 : f32 to vector<32x1xf32>
    %103 = vector.extract_strided_slice %0 {offsets = [0, 1], sizes = [32, 255], strides = [1, 1]} : vector<32x256xf32> to vector<32x255xf32>
    %104 = tpu.concatenate %103, %102 in 1 : vector<32x255xf32>, vector<32x1xf32> -> vector<32x256xf32>
    %105 = vector.broadcast %73 : vector<1x256xf32> to vector<32x256xf32>
    %106 = arith.mulf %104, %105 : vector<32x256xf32>
    %107 = arith.truncf %106 : vector<32x256xf32> to vector<32x256xbf16>
    %c160 = arith.constant 160 : index
    %c0_35 = arith.constant 0 : index
    %108 = vector.load %arg9[%c160, %c0_35] : memref<288x256xbf16, #tpu.memory_space<vmem>>, vector<32x256xbf16>
    tpu.vector_store %arg9[%c160, %c0_35], %107 {strides = array<i32>} : memref<288x256xbf16, #tpu.memory_space<vmem>>, vector<32x256xbf16>,
    %cst_36 = arith.constant 0.000000e+00 : f32
    %109 = vector.broadcast %cst_36 : f32 to vector<32x15xf32>
    %110 = vector.extract_strided_slice %0 {offsets = [0, 15], sizes = [32, 241], strides = [1, 1]} : vector<32x256xf32> to vector<32x241xf32>
    %111 = tpu.concatenate %110, %109 in 1 : vector<32x241xf32>, vector<32x15xf32> -> vector<32x256xf32>
    %112 = vector.broadcast %69 : vector<1x256xf32> to vector<32x256xf32>
    %113 = arith.mulf %111, %112 : vector<32x256xf32>
    %114 = arith.truncf %113 : vector<32x256xf32> to vector<32x256xbf16>
    %c192 = arith.constant 192 : index
    %c0_37 = arith.constant 0 : index
    %115 = vector.load %arg9[%c192, %c0_37] : memref<288x256xbf16, #tpu.memory_space<vmem>>, vector<32x256xbf16>
    tpu.vector_store %arg9[%c192, %c0_37], %114 {strides = array<i32>} : memref<288x256xbf16, #tpu.memory_space<vmem>>, vector<32x256xbf16>,
    %cst_38 = arith.constant 0.000000e+00 : f32
    %116 = vector.broadcast %cst_38 : f32 to vector<32x16xf32>
    %117 = vector.extract_strided_slice %0 {offsets = [0, 16], sizes = [32, 240], strides = [1, 1]} : vector<32x256xf32> to vector<32x240xf32>
    %118 = tpu.concatenate %117, %116 in 1 : vector<32x240xf32>, vector<32x16xf32> -> vector<32x256xf32>
    %119 = arith.truncf %118 : vector<32x256xf32> to vector<32x256xbf16>
    %c224 = arith.constant 224 : index
    %c0_39 = arith.constant 0 : index
    %120 = vector.load %arg9[%c224, %c0_39] : memref<288x256xbf16, #tpu.memory_space<vmem>>, vector<32x256xbf16>
    tpu.vector_store %arg9[%c224, %c0_39], %119 {strides = array<i32>} : memref<288x256xbf16, #tpu.memory_space<vmem>>, vector<32x256xbf16>,
    %cst_40 = arith.constant 0.000000e+00 : f32
    %121 = vector.broadcast %cst_40 : f32 to vector<32x17xf32>
    %122 = vector.extract_strided_slice %0 {offsets = [0, 17], sizes = [32, 239], strides = [1, 1]} : vector<32x256xf32> to vector<32x239xf32>
    %123 = tpu.concatenate %122, %121 in 1 : vector<32x239xf32>, vector<32x17xf32> -> vector<32x256xf32>
    %124 = vector.broadcast %73 : vector<1x256xf32> to vector<32x256xf32>
    %125 = arith.mulf %123, %124 : vector<32x256xf32>
    %126 = arith.truncf %125 : vector<32x256xf32> to vector<32x256xbf16>
    %c256 = arith.constant 256 : index
    %c0_41 = arith.constant 0 : index
    %127 = vector.load %arg9[%c256, %c0_41] : memref<288x256xbf16, #tpu.memory_space<vmem>>, vector<32x256xbf16>
    tpu.vector_store %arg9[%c256, %c0_41], %126 {strides = array<i32>} : memref<288x256xbf16, #tpu.memory_space<vmem>>, vector<32x256xbf16>,
    %c0_42 = arith.constant 0 : index
    %c0_43 = arith.constant 0 : index
    %128 = vector.load %arg5[%c0_42, %c0_43] : memref<32x288xbf16, #tpu.memory_space<vmem>>, vector<32x288xbf16>
    %c0_44 = arith.constant 0 : index
    %c0_45 = arith.constant 0 : index
    %129 = vector.load %arg9[%c0_44, %c0_45] : memref<288x256xbf16, #tpu.memory_space<vmem>>, vector<288x256xbf16>
    %cst_46 = arith.constant dense<0.000000e+00> : vector<32x256xf32>
    %130 = tpu.matmul %128, %129, %cst_46 {dimension_numbers = #tpu.dot_dimension_numbers<[1], [0], [0], [1], [0, 0, 1, 1], [], []>} : vector<32x288xbf16>, vector<288x256xbf16>, vector<32x256xf32> -> vector<32x256xf32>
    %131 = vector.broadcast %3 : vector<32x1xf32> to vector<32x256xf32>
    %132 = arith.addf %130, %131 : vector<32x256xf32>
    %c0_47 = arith.constant 0 : index
    %c0_48 = arith.constant 0 : index
    %133 = vector.load %arg7[%c0_47, %c0_48] : memref<32x32xf32, #tpu.memory_space<vmem>>, vector<32x32xf32>
    %cst_49 = arith.constant dense<0.000000e+00> : vector<32xf32>
    %134 = vector.multi_reduction <add>, %48, %cst_49 [1] : vector<32x256xf32> to vector<32xf32>
    %135 = vector.shape_cast %134 : vector<32xf32> to vector<32x1xf32>
    %cst_50 = arith.constant dense<0.000000e+00> : vector<32xf32>
    %136 = vector.multi_reduction <add>, %132, %cst_50 [1] : vector<32x256xf32> to vector<32xf32>
    %137 = vector.shape_cast %136 : vector<32xf32> to vector<32x1xf32>
    %138 = tpu.concatenate %135, %137 in 1 : vector<32x1xf32>, vector<32x1xf32> -> vector<32x2xf32>
    %cst_51 = arith.constant 3.906250e-03 : f32
    %139 = vector.broadcast %cst_51 : f32 to vector<32x2xf32>
    %140 = arith.mulf %138, %139 : vector<32x2xf32>
    %cst_52 = arith.constant dense<0.000000e+00> : vector<32x2xf32>
    %141 = tpu.matmul %133, %140, %cst_52 {dimension_numbers = #tpu.dot_dimension_numbers<[1], [0], [0], [1], [0, 0, 1, 1], [], []>} : vector<32x32xf32>, vector<32x2xf32>, vector<32x2xf32> -> vector<32x2xf32>
    %cst_53 = arith.constant 2.500000e-01 : f32
    %142 = vector.broadcast %cst_53 : f32 to vector<32x2xf32>
    %143 = arith.mulf %141, %142 : vector<32x2xf32>
    %144 = arith.subf %140, %143 : vector<32x2xf32>
    %145 = math.exp %144 : vector<32x2xf32>
    %cst_54 = arith.constant dense<0.000000e+00> : vector<32x2xf32>
    %146 = tpu.matmul %133, %145, %cst_54 {dimension_numbers = #tpu.dot_dimension_numbers<[1], [0], [0], [1], [0, 0, 1, 1], [], []>} : vector<32x32xf32>, vector<32x2xf32>, vector<32x2xf32> -> vector<32x2xf32>
    %147 = arith.divf %145, %146 : vector<32x2xf32>
    %148 = vector.extract_strided_slice %147 {offsets = [0, 0], sizes = [32, 1], strides = [1, 1]} : vector<32x2xf32> to vector<32x1xf32>
    %149 = vector.extract_strided_slice %147 {offsets = [0, 1], sizes = [32, 1], strides = [1, 1]} : vector<32x2xf32> to vector<32x1xf32>
    %150 = vector.broadcast %148 : vector<32x1xf32> to vector<32x256xf32>
    %151 = arith.mulf %150, %132 : vector<32x256xf32>
    %152 = vector.broadcast %149 : vector<32x1xf32> to vector<32x256xf32>
    %153 = arith.mulf %152, %48 : vector<32x256xf32>
    %154 = arith.addf %151, %153 : vector<32x256xf32>
    %cst_55 = arith.constant dense<0.000000e+00> : vector<32x256xf32>
    %155 = tpu.matmul %133, %154, %cst_55 {dimension_numbers = #tpu.dot_dimension_numbers<[1], [0], [0], [1], [0, 0, 1, 1], [], []>} : vector<32x32xf32>, vector<32x256xf32>, vector<32x256xf32> -> vector<32x256xf32>
    %156 = arith.negf %155 : vector<32x256xf32>
    %157 = math.exp %156 : vector<32x256xf32>
    %cst_56 = arith.constant 1.000000e+00 : f32
    %158 = vector.broadcast %cst_56 : f32 to vector<32x256xf32>
    %159 = arith.addf %158, %157 : vector<32x256xf32>
    %160 = arith.divf %158, %159 : vector<32x256xf32>
    %161 = arith.mulf %0, %160 : vector<32x256xf32>
    %c0_57 = arith.constant 0 : index
    %c0_58 = arith.constant 0 : index
    %162 = vector.load %arg8[%c0_57, %c0_58] : memref<32x256xf32, #tpu.memory_space<vmem>>, vector<32x256xf32>
    tpu.vector_store %arg8[%c0_57, %c0_58], %161 {strides = array<i32>} : memref<32x256xf32, #tpu.memory_space<vmem>>, vector<32x256xf32>,
    return
  }
  func.func @transform_0(%arg0: i32) -> (i32, i32) {
    %c0_i32 = arith.constant 0 : i32
    %c0_i32_0 = arith.constant 0 : i32
    return %arg0, %c0_i32 : i32, i32
  }
  func.func @transform_1(%arg0: i32) -> (i32, i32) {
    %c0_i32 = arith.constant 0 : i32
    %c0_i32_0 = arith.constant 0 : i32
    %c0_i32_1 = arith.constant 0 : i32
    return %c0_i32, %c0_i32_0 : i32, i32
  }
  func.func @transform_2(%arg0: i32) -> (i32, i32) {
    %c0_i32 = arith.constant 0 : i32
    %c0_i32_0 = arith.constant 0 : i32
    %c0_i32_1 = arith.constant 0 : i32
    return %c0_i32, %c0_i32_0 : i32, i32
  }
  func.func @transform_3(%arg0: i32) -> (i32, i32) {
    %c0_i32 = arith.constant 0 : i32
    %c0_i32_0 = arith.constant 0 : i32
    %c0_i32_1 = arith.constant 0 : i32
    return %c0_i32, %c0_i32_0 : i32, i32
  }
  func.func @transform_4(%arg0: i32) -> (i32, i32) {
    %c0_i32 = arith.constant 0 : i32
    %c0_i32_0 = arith.constant 0 : i32
    %c0_i32_1 = arith.constant 0 : i32
    return %c0_i32, %c0_i32_0 : i32, i32
  }
  func.func @transform_5(%arg0: i32) -> (i32, i32) {
    %c0_i32 = arith.constant 0 : i32
    %c0_i32_0 = arith.constant 0 : i32
    %c0_i32_1 = arith.constant 0 : i32
    return %c0_i32, %c0_i32_0 : i32, i32
  }
  func.func @transform_6(%arg0: i32) -> (i32, i32) {
    %c0_i32 = arith.constant 0 : i32
    %c0_i32_0 = arith.constant 0 : i32
    %c0_i32_1 = arith.constant 0 : i32
    return %c0_i32, %c0_i32_0 : i32, i32
  }
  func.func @transform_7(%arg0: i32) -> (i32, i32) {
    %c0_i32 = arith.constant 0 : i32
    %c0_i32_0 = arith.constant 0 : i32
    return %arg0, %c0_i32 : i32, i32
  }
}

</mosaic_0001>

<bundles_post_ra>
// kernel: ema_fn.1
= control target key start
LH: loop header
LB: loop body
LE: loop exit
PB: predicated region body
PF: predicated region fallthrough
CT: control target
= control target key end

     0   :  { %s2331_s11 = smov 1   ;;  %s2332_s12 = smov 15   ;;  %v2333_v42 = vmov 0   ;;  %vm153_vm0 = vcmask 261120   ;;  %vm801_vm1 = vcmask 7168   ;;  %vm275_vm7 = vcmask 130048   ;;  %s3385_s1 = inlined_call_operand.vmem [shape: f32[256,32], index: 1, kind: input, shape index: {}]   ;;  %s3386_s0 = inlined_call_operand.vmem [shape: f32[32,256], index: 0, kind: input, shape index: {}]   ;;  %s3387_s5 = inlined_call_operand.vmem [shape: f32[32,4], index: 5, kind: input, shape index: {}]   ;;  %s3388_s3 = inlined_call_operand.vmem [shape: f32[32,32], index: 3, kind: input, shape index: {}]   ;;  %s3389_s2 = inlined_call_operand.vmem [shape: f32[32,256], index: 2, kind: input, shape index: {}]   ;;  %s3390_s4 = inlined_call_operand.vmem [shape: bf16[32,288], index: 4, kind: input, shape index: {}]   ;;  %s3391_s6 = inlined_call_operand.vmem [shape: f32[32,32], index: 6, kind: input, shape index: {}]   ;;  %s3392_s7 = inlined_call_operand.vmem [shape: f32[32,256], index: 7, kind: output, shape index: {}]  }
   0x1   :  { %v54_v0 = vld [vmem:[%s3385_s1 + $0x78] sm:$0xff]  ;;  %v53_v2 = vld [vmem:[%s3385_s1 + $0x70] sm:$0xff]  ;;  %v52_v4 = vld [vmem:[%s3385_s1 + $0x68] sm:$0xff]  ;;  %2179 = vset.pattern.permute.xlu0 %v2333_v42  ;;  %2180 = vset.pattern.permute.xlu1 %v2333_v42  ;;  %s2334_s28 = smov 112   ;;  %s2336_s29 = smov 16   ;;  %vm752_vm9 = vcmask 121856  }
   0x2   :  { %v70_v1 = vld [vmem:[%s3385_s1 + $0xf8] sm:$0xff]  ;;  %71 = vmatpush.msra.mxu0 %v54_v0  ;;  %v69_v3 = vld [vmem:[%s3385_s1 + $0xf0] sm:$0xff]  ;;  %v68_v5 = vld [vmem:[%s3385_s1 + $0xe8] sm:$0xff]  ;;  %s2337_s30 = smov 17   ;;  %s2338_s8 = smov 127  }
   0x3   :  { %100 = vmatpush.msra.mxu1 %v70_v1  ;;  %v51_v6 = vld [vmem:[%s3385_s1 + $0x60] sm:$0xff]  ;;  %v50_v8 = vld [vmem:[%s3385_s1 + $0x58] sm:$0xff]  ;;  %v49_v10 = vld [vmem:[%s3385_s1 + $0x50] sm:$0xff]  ;;  %s2340_s13 = smov 111  }
   0x4   :  { %72 = vmatpush.msra.mxu0 %v53_v2  ;;  %v67_v7 = vld [vmem:[%s3385_s1 + $0xe0] sm:$0xff]  ;;  %v66_v9 = vld [vmem:[%s3385_s1 + $0xd8] sm:$0xff]  ;;  %v65_v11 = vld [vmem:[%s3385_s1 + $0xd0] sm:$0xff] }
   0x5   :  { %101 = vmatpush.msra.mxu1 %v69_v3  ;;  %v48_v12 = vld [vmem:[%s3385_s1 + $0x48] sm:$0xff]  ;;  %v47_v14 = vld [vmem:[%s3385_s1 + $0x40] sm:$0xff]  ;;  %v46_v16 = vld [vmem:[%s3385_s1 + $0x38] sm:$0xff] }
   0x6   :  { %73 = vmatpush.msra.mxu0 %v52_v4  ;;  %v64_v13 = vld [vmem:[%s3385_s1 + $0xc8] sm:$0xff]  ;;  %v63_v15 = vld [vmem:[%s3385_s1 + $0xc0] sm:$0xff]  ;;  %v62_v17 = vld [vmem:[%s3385_s1 + $0xb8] sm:$0xff] }
   0x7   :  { %102 = vmatpush.msra.mxu1 %v68_v5  ;;  %v45_v18 = vld [vmem:[%s3385_s1 + $0x30] sm:$0xff]  ;;  %v44_v20 = vld [vmem:[%s3385_s1 + $0x28] sm:$0xff]  ;;  %v43_v22 = vld [vmem:[%s3385_s1 + $0x20] sm:$0xff] }
   0x8   :  { %74 = vmatpush.msra.mxu0 %v51_v6  ;;  %v61_v19 = vld [vmem:[%s3385_s1 + $0xb0] sm:$0xff]  ;;  %v60_v21 = vld [vmem:[%s3385_s1 + $0xa8] sm:$0xff]  ;;  %v59_v23 = vld [vmem:[%s3385_s1 + $0xa0] sm:$0xff] }
   0x9   :  { %103 = vmatpush.msra.mxu1 %v67_v7  ;;  %v42_v24 = vld [vmem:[%s3385_s1 + $0x18] sm:$0xff]  ;;  %v41_v26 = vld [vmem:[%s3385_s1 + $0x10] sm:$0xff]  ;;  %v40_v28 = vld [vmem:[%s3385_s1 + $0x8] sm:$0xff] }
   0xa   :  { %75 = vmatpush.msra.mxu0 %v50_v8  ;;  %v58_v25 = vld [vmem:[%s3385_s1 + $0x98] sm:$0xff]  ;;  %v57_v27 = vld [vmem:[%s3385_s1 + $0x90] sm:$0xff]  ;;  %v56_v29 = vld [vmem:[%s3385_s1 + $0x88] sm:$0xff] }
   0xb   :  { %104 = vmatpush.msra.mxu1 %v66_v9  ;;  %v39_v30 = vld [vmem:[%s3385_s1] sm:$0xff]  ;;  %v2488_v33 = vld [vmem:[%s3386_s0 + $0x8] sm:$0xff]  ;;  %v2495_v34 = vld [vmem:[%s3386_s0 + $0x10] sm:$0xff] }
   0xc   :  { %76 = vmatpush.msra.mxu0 %v49_v10  ;;  %v55_v31 = vld [vmem:[%s3385_s1 + $0x80] sm:$0xff]  ;;  %v2500_v35 = vld [vmem:[%s3386_s0 + $0x18] sm:$0xff]  ;;  %v2512_v37 = vld [vmem:[%s3386_s0 + $0x28] sm:$0xff] }
   0xd   :  { %105 = vmatpush.msra.mxu1 %v65_v11  ;;  %v2483_v32 = vld [vmem:[%s3386_s0] sm:$0xff]  ;;  %v2519_v38 = vld [vmem:[%s3386_s0 + $0x30] sm:$0xff]  ;;  %v2524_v39 = vld [vmem:[%s3386_s0 + $0x38] sm:$0xff]  ;;  %v2206_v0 = vpack.i.bf16 %v2500_v35, %v2495_v34 }
   0xe   :  { %77 = vmatpush.msra.mxu0 %v48_v12  ;;  %v2507_v36 = vld [vmem:[%s3386_s0 + $0x20] sm:$0xff]  ;;  %v36_v48 = vld [vmem:[%s3387_s5 + $0x8] sm:$0xff]  ;;  %v37_v52 = vld [vmem:[%s3387_s5 + $0x10] sm:$0xff]  ;;  %v2186_v61 = vpack.i.bf16 %v2524_v39, %v2519_v38  ;;  %v2201_v62 = vpack.i.bf16 %v2488_v33, %v2483_v32  ;;  %v600_v12 = vlaneseq }
   0xf   :  { %106 = vmatpush.msra.mxu1 %v64_v13  ;;  %793 = vrot.lane.b32.xlu2 %v2507_v36, %s2331_s11  ;;  %v35_v45 = vld [vmem:[%s3387_s5] sm:$0xff]  ;;  %v2559_v57 = vld [vmem:[%s3387_s5 + $0x18] sm:$0xff]  ;;  %v130_v58 = vld [vmem:[%s3388_s3 + $0x8] sm:$0xff]  ;;  %v2181_v63 = vpack.i.bf16 %v2512_v37, %v2507_v36 }
  0x10   :  { %78 = vmatpush.msra.mxu0 %v47_v14  ;;  %135 = vperm.xlu0 %2179, %v35_v45   ;;  %v129_v56 = vld [vmem:[%s3388_s3] sm:$0xff]  ;;  %v131_v59 = vld [vmem:[%s3388_s3 + $0x10] sm:$0xff]  ;;  %v132_v60 = vld [vmem:[%s3388_s3 + $0x18] sm:$0xff]  ;;  %s2335_s3 = smov 113  }
  0x11   :  { %107 = vmatpush.msra.mxu1 %v63_v15  ;;  %145 = vperm.xlu1 %2180, %v37_v52   ;;  %v273_v4 = vld [vmem:[%s3389_s2 + $0x10] sm:$0xff]  ;;  %v271_v5 = vld [vmem:[%s3389_s2] sm:$0xff]  ;;  %v601_v15 = vand.u32 127, %v600_v12 }
  0x12   :  { %79 = vmatpush.msra.mxu0 %v46_v16  ;;  %302 = vmatpush.msra.mxu3 %v273_v4 }
  0x13   :  { %108 = vmatpush.msra.mxu1 %v62_v17  ;;  %v607_v17 = vand.u32 15, %v601_v15 }
  0x14   :  { %80 = vmatpush.msra.mxu0 %v45_v18  ;;  %303 = vmatpush.msra.mxu3 %v271_v5  ;;  %v602_v18 = vadd.s32 128, %v601_v15 }
  0x15   :  { %109 = vmatpush.msra.mxu1 %v61_v19  ;;  %vm627_vm2 = vcmp.ge.s32.totalorder %v607_v17, 1  ;;  %vm633_vm4 = vcmp.le.s32.totalorder %v607_v17, 14 }
  0x16   :  { %81 = vmatpush.msra.mxu0 %v44_v20 }
  0x17   :  { %110 = vmatpush.msra.mxu1 %v60_v21  ;;  %799 = vrot.lane.b32.xlu2 %v2524_v39, %s2331_s11 }
  0x18   :  { %82 = vmatpush.msra.mxu0 %v43_v22  ;;  %140 = vperm.xlu0 %2179, %v36_v48  }
  0x19   :  { %111 = vmatpush.msra.mxu1 %v59_v23  ;;  %150 = vperm.xlu1 %2180, %v2559_v57  }
  0x1a   :  { %83 = vmatpush.msra.mxu0 %v42_v24 }
  0x1b   :  { %112 = vmatpush.msra.mxu1 %v58_v25  ;;  %v614_v25 = vand.u32 15, %v602_v18 }
  0x1c   :  { %84 = vmatpush.msra.mxu0 %v41_v26 }
  0x1d   :  { %113 = vmatpush.msra.mxu1 %v57_v27  ;;  %v2339_v27 = vmov 0.0   ;;  %vm628_vm3 = vcmp.ge.s32.totalorder %v614_v25, 1  ;;  %vm634_vm10 = vcmp.le.s32.totalorder %v614_v25, 14 }
  0x1e   :  { %85 = vmatpush.msra.mxu0 %v40_v28  ;;  %v2643_v28 = vsel %vm627_vm2, 1.0, %v2339_v27  ;;  %v2675_v5 = vsel %vm633_vm4, 1.0, %v2339_v27  ;;  %v2691_v18 = vsel %vm634_vm10, 1.0, %v2339_v27  ;;  %vm956_vm4 = vcmask 916480  }
  0x1f   :  { %114 = vmatpush.msra.mxu1 %v56_v29  ;;  %787 = vrot.lane.b32.xlu2 %v2488_v33, %s2331_s11 }
  0x20   :  { %86 = vmatpush.msra.mxu0 %v39_v30  ;;  %795 = vrot.lane.b32.xlu0 %v2512_v37, %s2331_s11 }
  0x21   :  { %115 = vmatpush.msra.mxu1 %v55_v31  ;;  %87 = vmatmul.f32.vlgmr.msra.gmra.mxu0 %v2483_v32 }
  0x22   :  { %116 = vmatmul.f32.vlgmr.msra.gmra.mxu1 %v2488_v33  ;;  %797 = vrot.lane.b32.xlu1 %v2519_v38, %s2331_s11 }
  0x27   :  { %744 = vrot.lane.b32.xlu2 %v2507_v36, %s2332_s12 }
  0x28   :  { %789 = vrot.lane.b32.xlu0 %v2495_v34, %s2331_s11 }
  0x29   :  { %90 = vmatmul.f32.gmra.mxu0 %v2495_v34 }
  0x2a   :  { %119 = vmatmul.f32.gmra.mxu1 %v2500_v35  ;;  %785 = vrot.lane.b32.xlu1 %v2483_v32, %s2331_s11 }
  0x2f   :  { %750 = vrot.lane.b32.xlu2 %v2524_v39, %s2332_s12 }
  0x30   :  { %746 = vrot.lane.b32.xlu0 %v2512_v37, %s2332_s12 }
  0x31   :  { %93 = vmatmul.f32.gmra.mxu0 %v2507_v36 }
  0x32   :  { %122 = vmatmul.f32.gmra.mxu1 %v2512_v37  ;;  %791 = vrot.lane.b32.xlu1 %v2500_v35, %s2331_s11 }
  0x37   :  { %738 = vrot.lane.b32.xlu2 %v2488_v33, %s2332_s12 }
  0x38   :  { %740 = vrot.lane.b32.xlu0 %v2495_v34, %s2332_s12 }
  0x39   :  { %96 = vmatmul.f32.gmra.mxu0 %v2519_v38 }
  0x3a   :  { %125 = vmatmul.f32.gmra.mxu1 %v2524_v39  ;;  %748 = vrot.lane.b32.xlu1 %v2519_v38, %s2332_s12 }
  0x3f   :  { %2182 = vrot.lane.b32.xlu2 %v2181_v63, %s2334_s28 }
  0x40   :  { %2187 = vrot.lane.b32.xlu0 %v2186_v61, %s2334_s28 }
  0x42   :  { %736 = vrot.lane.b32.xlu1 %v2483_v32, %s2332_s12 }
  0x47   :  { %2197 = vrot.lane.b32.xlu2 %v2186_v61, %s2336_s29 }
  0x48   :  { %2202 = vrot.lane.b32.xlu0 %v2201_v62, %s2334_s28 }
  0x4a   :  { %742 = vrot.lane.b32.xlu1 %v2500_v35, %s2332_s12 }
  0x4f   :  { %903 = vrot.lane.b32.xlu2 %v2519_v38, %s2335_s3 }
  0x50   :  { %899 = vrot.lane.b32.xlu0 %v2507_v36, %s2335_s3 }
  0x52   :  { %2192 = vrot.lane.b32.xlu1 %v2181_v63, %s2336_s29 }
  0x57   :  { %2217 = vrot.lane.b32.xlu2 %v2206_v0, %s2336_s29 }
  0x58   :  { %905 = vrot.lane.b32.xlu0 %v2524_v39, %s2335_s3 }
  0x5a   :  { %2207 = vrot.lane.b32.xlu1 %v2206_v0, %s2334_s28 }
  0x5f   :  { %659 = vrot.lane.b32.xlu2 %v2519_v38, %s2337_s30 }
  0x60   :  { %655 = vrot.lane.b32.xlu0 %v2507_v36, %s2337_s30 }
  0x62   :  { %901 = vrot.lane.b32.xlu1 %v2512_v37, %s2335_s3 }
  0x67   :  { %893 = vrot.lane.b32.xlu2 %v2488_v33, %s2335_s3 }
  0x68   :  { %661 = vrot.lane.b32.xlu0 %v2524_v39, %s2337_s30 }
  0x69   :  { %v794_v2 = vpop.permute.xlu2 %793 }
  0x6a   :  { %2212 = vrot.lane.b32.xlu1 %v2201_v62, %s2336_s29  ;;  %v816_v29 = vsel %vm801_vm1, 0.0, %v794_v2 }
  0x70   :  { %895 = vrot.lane.b32.xlu0 %v2495_v34, %s2335_s3 }
  0x71   :  { %v800_v10 = vpop.permute.xlu2 %799 }
  0x72   :  { %657 = vrot.lane.b32.xlu1 %v2512_v37, %s2337_s30 }
  0x78   :  { %649 = vrot.lane.b32.xlu0 %v2488_v33, %s2337_s30 }
  0x79   :  { %v788_v19 = vpop.permute.xlu2 %787 }
  0x7a   :  { %891 = vrot.lane.b32.xlu1 %v2483_v32, %s2335_s3 }
  0x81   :  { %v2660_v52 = vpop.permute.xlu2 %744 }
  0x82   :  { %897 = vrot.lane.b32.xlu1 %v2500_v35, %s2335_s3  ;;  %v136_v6 = vpop.permute.xlu0 %135 }
  0x83   :  { %v146_v1 = vpop.permute.xlu1 %145 }
  0x89   :  { %v751_v17 = vpop.permute.xlu2 %750 }
  0x8a   :  { %651 = vrot.lane.b32.xlu1 %v2495_v34, %s2337_s30  ;;  %v141_v13 = vpop.permute.xlu0 %140 }
  0x8b   :  { %v2627_v3 = vpop.permute.xlu1 %150 }
  0x92   :  { %852 = vrot.lane.b32.xlu1 %v2512_v37, %s2338_s8  ;;  %v796_v45 = vpop.permute.xlu0 %795 }
  0x94   :  { %v798_v9 = vpop.permute.xlu1 %797 }
  0x95   :  { %v817_v23 = vsel %vm801_vm1, 0.0, %v798_v9  ;;  %v805_v30 = vsel %vm801_vm1, %v798_v9, %v800_v10  ;;  %v349_v9 = vld [vmem:[%s3389_s2 + $0x38] sm:$0xff] }
  0x96   :  { %409 = vmatpush.msrb.mxu0 %v349_v9 }
  0x9a   :  { %842 = vrot.lane.b32.xlu1 %v2483_v32, %s2338_s8 }
  0x9c   :  { %v786_v20 = vpop.permute.xlu1 %785 }
  0x9d   :  { %v814_v26 = vsel %vm801_vm1, 0.0, %v786_v20  ;;  %v802_v31 = vsel %vm801_vm1, %v786_v20, %v788_v19 }
  0x9e   :  { %v88_v40 = vpop.f32.mrf.mxu0 }
  0x9f   :  { %v117_v41 = vpop.f32.mrf.mxu1 }
  0xa0   :  { %v118_v55 = vadd.f32 %v117_v41, %v88_v40  ;;  %v824_v40 = vmul.f32 %v2643_v28, %v817_v23  ;;  %v818_v41 = vmul.f32 %v2643_v28, %v814_v26 }
  0xa2   :  { %848 = vrot.lane.b32.xlu1 %v2500_v35, %s2338_s8 }
  0xa6   :  { %v91_v43 = vpop.f32.mrf.mxu0 }
  0xa7   :  { %v120_v44 = vpop.f32.mrf.mxu1 }
  0xa8   :  { %v121_v54 = vadd.f32 %v120_v44, %v91_v43  ;;  %v2653_v44 = vsel %vm628_vm3, 1.0, %v2339_v27 }
  0xa9   :  { %v825_v48 = vmul.f32 %v2653_v44, %v805_v30 }
  0xaa   :  { %993 = vrot.lane.b32.xlu1 %v2519_v38, %s2340_s13 }
  0xae   :  { %v94_v46 = vpop.f32.mrf.mxu0 }
  0xaf   :  { %v123_v47 = vpop.f32.mrf.mxu1 }
  0xb0   :  { %v124_v53 = vadd.f32 %v123_v47, %v94_v46  ;;  %v822_v47 = vmul.f32 %v2643_v28, %v816_v29 }
  0xb2   :  { %983 = vrot.lane.b32.xlu1 %v2488_v33, %s2340_s13 }
  0xb6   :  { %v97_v49 = vpop.f32.mrf.mxu0 }
  0xb7   :  { %v126_v50 = vpop.f32.mrf.mxu1 }
  0xb8   :  { %v127_v51 = vadd.f32 %v126_v50, %v97_v49  ;;  %v819_v49 = vmul.f32 %v2653_v44, %v802_v31 }
  0xba   :  { %178 = vmatpush.msra.mxu2 %v127_v51  ;;  %v804_v51 = vsel %vm801_vm1, %v794_v2, %v796_v45 }
  0xbc   :  { %179 = vmatpush.msra.mxu2 %v124_v53  ;;  %v792_v53 = vpop.permute.xlu1 %791 }
  0xbe   :  { %180 = vmatpush.msra.mxu2 %v121_v54 }
  0xc0   :  { %181 = vmatpush.msra.mxu2 %v118_v55 }
  0xc1   :  { %1892 = vmatmul.msk.f32.vlgmr.msra.gmra.mxu2 %vm153_vm0, %v129_v56  ;;  %v829_v56 = vpack.c.bf16 %v825_v48, %v824_v40 }
  0xc3   :  { %833 = vst [vmem:[#allocation2 + $0x78] sm:$0xff] %v829_v56 }
  0xc4   :  { %v749_v19 = vpop.permute.xlu1 %748 }
  0xc5   :  { %v768_v23 = vsel %vm752_vm9, 0.0, %v749_v19 }
  0xc6   :  { %v775_v27 = vmul.f32 %v2675_v5, %v768_v23 }
  0xc9   :  { %1893 = vmatmul.msk.f32.gmra.mxu2 %vm153_vm0, %v130_v58  ;;  %v826_v58 = vpack.c.bf16 %v819_v49, %v818_v41  ;;  %v767_v41 = vsel %vm752_vm9, 0.0, %v2660_v52 }
  0xca   :  { %v2137_v49 = vld [vmem:[#allocation2 + $0x74] sm:$0xf0]  ;;  %v2004_v56 = vld [vmem:[#allocation2 + $0x78] sm:$0xf0] }
  0xcb   :  { %830 = vst [vmem:[#allocation2 + $0x60] sm:$0xff] %v826_v58 }
  0xd1   :  { %1894 = vmatmul.msk.f32.gmra.mxu2 %vm153_vm0, %v131_v59  ;;  %v823_v59 = vmul.f32 %v2653_v44, %v804_v51  ;;  %v347_v51 = vld [vmem:[%s3389_s2 + $0x28] sm:$0xff] }
  0xd2   :  { %410 = vmatpush.msrb.mxu0 %v347_v51 }
  0xd3   :  { %v828_v63 = vpack.c.bf16 %v823_v59, %v822_v47 }
  0xd5   :  { %832 = vst [vmem:[#allocation2 + $0x70] sm:$0xff] %v828_v63  ;;  %v739_v63 = vpop.permute.xlu2 %738 }
  0xd9   :  { %1895 = vmatmul.msk.f32.gmra.mxu2 %vm153_vm0, %v132_v60 }
  0xdc   :  { %v2002_v48 = vld [vmem:[#allocation2 + $0x70] sm:$0xf] }
 0x144   :  { %v183_v7 = vpop.f32.mrf.mxu2 }
 0x145   :  { %v184_v8 = vadd.f32 %v183_v7, %v136_v6  ;;  %v790_v6 = vpop.permute.xlu0 %789  ;;  %v274_v7 = vld [vmem:[%s3389_s2 + $0x18] sm:$0xff] }
 0x146   :  { %v803_v12 = vsel %vm801_vm1, %v790_v6, %v792_v53  ;;  %331 = vmatpush.msrb.mxu3 %v274_v7  ;;  %v2003_v53 = vor.u32 %v2137_v49, %v2002_v48 }
 0x147   :  { %v1896_v11 = vmul.f32 -1.442695, %v184_v8  ;;  %v272_v8 = vld [vmem:[%s3389_s2 + $0x8] sm:$0xff] }
 0x148   :  { %332 = vmatpush.msrb.mxu3 %v272_v8  ;;  %1306 = vmatpush.bf16.msrb.mxu1 %v2003_v53 }
 0x149   :  { %2239 = vpow2.f32 %v1896_v11 }
 0x14c   :  { %v186_v14 = vpop.f32.mrf.mxu2 }
 0x14d   :  { %v187_v16 = vadd.f32 %v186_v14, %v141_v13  ;;  %v815_v13 = vsel %vm801_vm1, 0.0, %v790_v6 }
 0x14e   :  { %v820_v15 = vmul.f32 %v2643_v28, %v815_v13 }
 0x14f   :  { %v2240_v21 = vpop.eup %2239  ;;  %v1897_v22 = vmul.f32 -1.442695, %v187_v16  ;;  %v821_v16 = vmul.f32 %v2653_v44, %v803_v12 }
 0x150   :  { %v2640_v24 = vadd.f32 1.0, %v2240_v21 }
 0x151   :  { %2241 = vpow2.f32 %v1897_v22  ;;  %v827_v29 = vpack.c.bf16 %v821_v16, %v820_v15 }
 0x152   :  { %2243 = vrcp.f32 %v2640_v24  ;;  %v220_v50 = vand.u32 2147483647, %v2640_v24  ;;  %v222_v0 = vand.u32 2147483648, %v2640_v24  ;;  %vm216_vm5 = vweird.f32 %v2640_v24 }
 0x153   :  { %831 = vst [vmem:[#allocation2 + $0x68] sm:$0xff] %v827_v29 }
 0x154   :  { %v189_v43 = vpop.f32.mrf.mxu2  ;;  %vm2671_vm6 = vcmp.eq.f32.partialorder %v220_v50, 8.507059e+37  ;;  %v223_v14 = vor.u32 1.1754944e-38, %v222_v0  ;;  %v773_v50 = vmul.f32 %v2675_v5, %v767_v41  ;;  %v737_v0 = vpop.permute.xlu1 %736 }
 0x155   :  { %v190_v46 = vadd.f32 %v189_v43, %v146_v1  ;;  %v753_v6 = vsel %vm752_vm9, %v737_v0, %v739_v63  ;;  %v765_v7 = vsel %vm752_vm9, 0.0, %v737_v0 }
 0x157   :  { %v2242_v54 = vpop.eup %2241  ;;  %v1898_v55 = vmul.f32 -1.442695, %v190_v46 }
 0x158   :  { %v2244_v60 = vpop.eup %2243  ;;  %v2663_v61 = vadd.f32 1.0, %v2242_v54  ;;  %v747_v54 = vpop.permute.xlu0 %746 }
 0x159   :  { %2245 = vpow2.f32 %v1898_v55  ;;  %v212_v62 = vmul.f32 %v2244_v60, %v2640_v24  ;;  %vm217_vm8 = vweird.f32 %v2244_v60  ;;  %v2136_v55 = vld [vmem:[#allocation2 + $0x74] sm:$0xf]  ;;  %v755_v59 = vsel %vm752_vm9, %v2660_v52, %v747_v54  ;;  %v1994_v54 = vld [vmem:[#allocation2 + $0x60] sm:$0xf] }
 0x15a   :  { %2247 = vrcp.f32 %v2663_v61  ;;  %vm218_vm11 = vmor %vm216_vm5, %vm217_vm8  ;;  %v235_v24 = vand.u32 2147483647, %v2663_v61  ;;  %v237_v46 = vand.u32 2147483648, %v2663_v61  ;;  %vm231_vm13 = vweird.f32 %v2663_v61 }
 0x15b   :  { %v213_v1 = vsub.f32 1.0, %v212_v62  ;;  %v774_v62 = vmul.f32 %v2691_v18, %v755_v59  ;;  %v2134_v59 = vld [vmem:[#allocation2 + $0x64] sm:$0xf] }
 0x15c   :  { %v192_v4 = vpop.f32.mrf.mxu2  ;;  %vm236_vm15 = vcmp.eq.f32.partialorder %v235_v24, 8.507059e+37  ;;  %v743_v23 = vpop.permute.xlu1 %742 }
 0x15d   :  { %v193_v10 = vadd.f32 %v192_v4, %v2627_v3  ;;  %v214_v11 = vmul.f32 %v2244_v60, %v213_v1  ;;  %v756_v3 = vsel %vm752_vm9, %v749_v19, %v751_v17  ;;  %v238_v4 = vor.u32 1.1754944e-38, %v237_v46 }
 0x15e   :  { %v776_v30 = vmul.f32 %v2691_v18, %v756_v3  ;;  %v779_v52 = vpack.c.bf16 %v774_v62, %v773_v50  ;;  %v2183_v3 = vpop.permute.xlu2 %2182 }
 0x15f   :  { %v2246_v20 = vpop.eup %2245  ;;  %v1899_v21 = vmul.f32 -1.442695, %v193_v10  ;;  %v215_v22 = vadd.f32 %v2244_v60, %v214_v11  ;;  %v770_v10 = vmul.f32 %v2691_v18, %v753_v6  ;;  %v2185_v29 = vunpack.i.h.bf16 %v2183_v3 }
 0x160   :  { %v2248_v25 = vpop.eup %2247  ;;  %v2695_v26 = vadd.f32 1.0, %v2246_v20  ;;  %v780_v47 = vpack.c.bf16 %v776_v30, %v775_v27  ;;  %783 = vst [vmem:[#allocation2 + $0x50] sm:$0xff] %v779_v52  ;;  %v741_v19 = vpop.permute.xlu0 %740  ;;  %v2184_v27 = vunpack.i.l.bf16 %v2183_v3 }
 0x161   :  { %2249 = vpow2.f32 %v1899_v21  ;;  %v219_v31 = vsel %vm218_vm11, %v2244_v60, %v215_v22  ;;  %v227_v40 = vmul.f32 %v2248_v25, %v2663_v61  ;;  %vm232_vm12 = vweird.f32 %v2248_v25 }
 0x162   :  { %2251 = vrcp.f32 %v2695_v26  ;;  %v2708_v43 = vsel %vm2671_vm6, %v223_v14, %v219_v31  ;;  %784 = vst [vmem:[#allocation2 + $0x58] sm:$0xff] %v780_v47  ;;  %v2007_v60 = vor.u32 %v2136_v55, %v2004_v56  ;;  %vm233_vm14 = vmor %vm231_vm13, %vm232_vm12  ;;  %v769_v61 = vmul.f32 %v2675_v5, %v765_v7  ;;  %v2135_v55 = vld [vmem:[#allocation2 + $0x64] sm:$0xf0] }
 0x163   :  { %350 = vrot.lane.b32.xlu2 %v2708_v43, %s2334_s28  ;;  %1900 = vmatmul.msk.f32.vlgmr.msra.gmra.mxu3 %vm275_vm7, %v2708_v43  ;;  %v228_v45 = vsub.f32 1.0, %v227_v40  ;;  %v250_v16 = vand.u32 2147483647, %v2695_v26  ;;  %v252_v17 = vand.u32 2147483648, %v2695_v26  ;;  %v766_v21 = vsel %vm752_vm9, 0.0, %v741_v19 }
 0x164   :  { %1363 = vmatpush.bf16.msra.mxu0 %v2007_v60  ;;  %v777_v15 = vpack.c.bf16 %v770_v10, %v769_v61  ;;  %vm246_vm3 = vweird.f32 %v2695_v26  ;;  %v771_v22 = vmul.f32 %v2675_v5, %v766_v21  ;;  %v754_v30 = vsel %vm752_vm9, %v741_v19, %v743_v23  ;;  %v1996_v60 = vld [vmem:[#allocation2 + $0x68] sm:$0xf0]  ;;  %v2193_v6 = vpop.permute.xlu1 %2192 }
 0x165   :  { %v229_v58 = vmul.f32 %v2248_v25, %v228_v45  ;;  %vm251_vm6 = vcmp.eq.f32.partialorder %v250_v16, 8.507059e+37  ;;  %v253_v40 = vor.u32 1.1754944e-38, %v252_v17  ;;  %v772_v41 = vmul.f32 %v2691_v18, %v754_v30 }
 0x166   :  { %781 = vst [vmem:[#allocation2 + $0x40] sm:$0xff] %v777_v15  ;;  %v971_v46 = vsel %vm956_vm4, %v2185_v29, 0.0  ;;  %v959_v49 = vsel %vm956_vm4, %v2184_v27, %v2185_v29  ;;  %vm907_vm12 = vcmask 924672   ;;  %vm663_vm13 = vcmask 138240  }
 0x167   :  { %v2250_v1 = vpop.eup %2249  ;;  %v230_v2 = vadd.f32 %v2248_v25, %v229_v58  ;;  %v778_v50 = vpack.c.bf16 %v772_v41, %v771_v22  ;;  %v975_v53 = vpack.c.bf16 %v971_v46, %v959_v49  ;;  %v1995_v58 = vor.u32 %v2135_v55, %v1994_v54  ;;  %v1986_v22 = vld [vmem:[#allocation2 + $0x50] sm:$0xf]  ;;  %v2132_v27 = vld [vmem:[#allocation2 + $0x54] sm:$0xf] }
 0x168   :  { %v2252_v8 = vpop.eup %2251  ;;  %v2726_v9 = vadd.f32 1.0, %v2250_v1  ;;  %v2188_v56 = vpop.permute.xlu0 %2187  ;;  %v1999_v1 = vor.u32 %v2134_v59, %v1996_v60 }
 0x169   :  { %v234_v11 = vsel %vm233_vm14, %v2248_v25, %v230_v2  ;;  %v242_v12 = vmul.f32 %v2252_v8, %v2695_v26  ;;  %vm247_vm2 = vweird.f32 %v2252_v8  ;;  %782 = vst [vmem:[#allocation2 + $0x48] sm:$0xff] %v778_v50  ;;  %v2190_v63 = vunpack.i.h.bf16 %v2188_v56  ;;  %1307 = vmatpush.bf16.msrb.mxu1 %v1995_v58  ;;  %v2133_v3 = vld [vmem:[#allocation2 + $0x54] sm:$0xf0]  ;;  %v1988_v30 = vld [vmem:[#allocation2 + $0x58] sm:$0xf0]  ;;  %v348_v58 = vld [vmem:[%s3389_s2 + $0x30] sm:$0xff] }
 0x16a   :  { %2253 = vrcp.f32 %v2726_v9  ;;  %v2733_v13 = vsel %vm236_vm15, %v238_v4, %v234_v11  ;;  %vm248_vm5 = vmor %vm246_vm3, %vm247_vm2  ;;  %v265_v26 = vand.u32 2147483647, %v2726_v9  ;;  %v267_v48 = vand.u32 2147483648, %v2726_v9  ;;  %979 = vst [vmem:[#allocation2 + $0xf0] sm:$0xff] %v975_v53  ;;  %v2198_v4 = vpop.permute.xlu2 %2197  ;;  %1364 = vmatpush.bf16.msra.mxu0 %v1999_v1  ;;  %380 = vmatpush.msrb.mxu2 %v348_v58 }
 0x16b   :  { %352 = vrot.lane.b32.xlu0 %v2733_v13, %s2334_s28  ;;  %647 = vrot.lane.b32.xlu2 %v2483_v32, %s2337_s30  ;;  %v243_v14 = vsub.f32 1.0, %v242_v12  ;;  %v2189_v0 = vunpack.i.l.bf16 %v2188_v56  ;;  %vm261_vm9 = vweird.f32 %v2726_v9  ;;  %v2200_v61 = vunpack.i.h.bf16 %v2198_v4 }
 0x16c   :  { %1901 = vmatmul.msk.f32.gmra.mxu3 %vm275_vm7, %v2733_v13  ;;  %v268_v2 = vor.u32 1.1754944e-38, %v267_v48  ;;  %v2199_v11 = vunpack.i.l.bf16 %v2198_v4  ;;  %v2195_v12 = vunpack.i.h.bf16 %v2193_v6  ;;  %vm266_vm11 = vcmp.eq.f32.partialorder %v265_v26, 8.507059e+37 }
 0x16d   :  { %v244_v20 = vmul.f32 %v2252_v8, %v243_v14  ;;  %v960_v52 = vsel %vm956_vm4, %v2189_v0, %v2190_v63  ;;  %v2194_v14 = vunpack.i.l.bf16 %v2193_v6  ;;  %v1987_v29 = vor.u32 %v2133_v3, %v1986_v22  ;;  %v1978_v55 = vld [vmem:[#allocation2 + $0x40] sm:$0xf] }
 0x16e   :  { %v715_v16 = vsel %vm275_vm7, %v2199_v11, %v2200_v61  ;;  %v727_v17 = vsel %vm275_vm7, 0.0, %v2199_v11  ;;  %v1991_v41 = vor.u32 %v2132_v27, %v1988_v30  ;;  %vm858_vm14 = vcmask 1039360  }
 0x16f   :  { %v245_v25 = vadd.f32 %v2252_v8, %v244_v20  ;;  %v714_v19 = vsel %vm275_vm7, %v2194_v14, %v2195_v12  ;;  %v731_v20 = vpack.c.bf16 %v715_v16, %v727_v17  ;;  %v726_v21 = vsel %vm275_vm7, 0.0, %v2194_v14  ;;  %1308 = vmatpush.bf16.msrb.mxu1 %v1987_v29 }
 0x170   :  { %v2254_v31 = vpop.eup %2253  ;;  %v730_v23 = vpack.c.bf16 %v714_v19, %v726_v21  ;;  %1365 = vmatpush.bf16.msra.mxu0 %v1991_v41  ;;  %v2131_v56 = vld [vmem:[#allocation2 + $0x44] sm:$0xf0]  ;;  %vm997_vm15 = vcmask 908288  }
 0x171   :  { %v249_v24 = vsel %vm248_vm5, %v2252_v8, %v245_v25  ;;  %v257_v45 = vmul.f32 %v2254_v31, %v2726_v9  ;;  %vm262_vm8 = vweird.f32 %v2254_v31  ;;  %v972_v8 = vsel %vm956_vm4, %v2190_v63, 0.0  ;;  %v2203_v25 = vpop.permute.xlu0 %2202  ;;  %735 = vst [vmem:[#allocation2 + $0x38] sm:$0xff] %v731_v20  ;;  %v1980_v63 = vld [vmem:[#allocation2 + $0x48] sm:$0xf0]  ;;  %v2066_v1 = vld [vmem:[#allocation2 + $0xf0] sm:$0xf] }
 0x172   :  { %v2751_v47 = vsel %vm251_vm6, %v253_v40, %v249_v24  ;;  %vm263_vm10 = vmor %vm261_vm9, %vm262_vm8  ;;  %v976_v10 = vpack.c.bf16 %v972_v8, %v960_v52  ;;  %v2204_v40 = vunpack.i.l.bf16 %v2203_v25  ;;  %734 = vst [vmem:[#allocation2 + $0x30] sm:$0xff] %v730_v23  ;;  %v2777_v24 = vpop.permute.xlu2 %903  ;;  %v1979_v60 = vor.u32 %v2131_v56, %v1978_v55 }
 0x173   :  { %354 = vrot.lane.b32.xlu0 %v2751_v47, %s2334_s28  ;;  %653 = vrot.lane.b32.xlu2 %v2500_v35, %s2337_s30  ;;  %v258_v51 = vsub.f32 1.0, %v257_v45  ;;  %v2208_v45 = vpop.permute.xlu1 %2207 }
 0x174   :  { %1902 = vmatmul.msk.f32.gmra.mxu3 %vm275_vm7, %v2751_v47  ;;  %980 = vst [vmem:[#allocation2 + $0xf8] sm:$0xff] %v976_v10  ;;  %v2210_v48 = vunpack.i.h.bf16 %v2208_v45  ;;  %v2209_v49 = vunpack.i.l.bf16 %v2208_v45  ;;  %1309 = vmatpush.bf16.msrb.mxu1 %v1979_v60 }
 0x175   :  { %v259_v62 = vmul.f32 %v2254_v31, %v258_v51 }
 0x176   :  { %v970_v51 = vsel %vm956_vm4, %v2210_v48, 0.0  ;;  %v958_v53 = vsel %vm956_vm4, %v2209_v49, %v2210_v48 }
 0x177   :  { %v260_v7 = vadd.f32 %v2254_v31, %v259_v62  ;;  %v974_v54 = vpack.c.bf16 %v970_v51, %v958_v53  ;;  %v2130_v62 = vld [vmem:[#allocation2 + $0x44] sm:$0xf] }
 0x178   :  { %v1983_v0 = vor.u32 %v2130_v62, %v1980_v63  ;;  %v1972_v14 = vld [vmem:[#allocation2 + $0x38] sm:$0xf0] }
 0x179   :  { %v264_v15 = vsel %vm263_vm10, %v2254_v31, %v260_v7  ;;  %v2205_v31 = vunpack.i.h.bf16 %v2203_v25  ;;  %978 = vst [vmem:[#allocation2 + $0xe8] sm:$0xff] %v974_v54  ;;  %v900_v59 = vpop.permute.xlu0 %899  ;;  %v1970_v8 = vld [vmem:[#allocation2 + $0x30] sm:$0xf]  ;;  %v2128_v52 = vld [vmem:[#allocation2 + $0x34] sm:$0xf] }
 0x17a   :  { %v2765_v9 = vsel %vm266_vm11, %v268_v2, %v264_v15  ;;  %v2218_v4 = vpop.permute.xlu2 %2217  ;;  %1366 = vmatpush.bf16.msra.mxu0 %v1983_v0  ;;  %v1975_v22 = vor.u32 %v2128_v52, %v1972_v14 }
 0x17b   :  { %850 = vrot.lane.b32.xlu0 %v2507_v36, %s2338_s8  ;;  %356 = vrot.lane.b32.xlu2 %v2765_v9, %s2334_s28  ;;  %v969_v26 = vsel %vm956_vm4, %v2205_v31, 0.0  ;;  %v957_v46 = vsel %vm956_vm4, %v2204_v40, %v2205_v31  ;;  %v2153_v2 = vld [vmem:[#allocation2 + $0xf4] sm:$0xf0]  ;;  %v902_v6 = vpop.permute.xlu1 %901  ;;  %v2220_v61 = vunpack.i.h.bf16 %v2218_v4  ;;  %v2219_v10 = vunpack.i.l.bf16 %v2218_v4 }
 0x17c   :  { %1903 = vmatmul.msk.f32.gmra.mxu3 %vm275_vm7, %v2765_v9  ;;  %v973_v50 = vpack.c.bf16 %v969_v26, %v957_v46  ;;  %v2067_v7 = vor.u32 %v2153_v2, %v2066_v1  ;;  %v910_v11 = vsel %vm907_vm12, %v900_v59, %v902_v6  ;;  %v922_v12 = vsel %vm907_vm12, %v902_v6, 0.0 }
 0x17d   :  { %v928_v15 = vmul.f32 %v2643_v28, %v910_v11  ;;  %v929_v16 = vmul.f32 %v2653_v44, %v922_v12  ;;  %v713_v19 = vsel %vm275_vm7, %v2219_v10, %v2220_v61  ;;  %v725_v20 = vsel %vm275_vm7, 0.0, %v2219_v10 }
 0x17e   :  { %977 = vst [vmem:[#allocation2 + $0xe0] sm:$0xff] %v973_v50  ;;  %2158 = vmatpush.bf16.msra.mxu3 %v2067_v7  ;;  %v729_v3 = vpack.c.bf16 %v713_v19, %v725_v20  ;;  %1367 = vmatpush.bf16.msra.mxu0 %v1975_v22 }
 0x17f   :  { %v934_v23 = vpack.c.bf16 %v929_v16, %v928_v15 }
 0x180   :  { %v2151_v25 = vld [vmem:[#allocation2 + $0xe4] sm:$0xf0]  ;;  %733 = vst [vmem:[#allocation2 + $0x28] sm:$0xff] %v729_v3 }
 0x181   :  { %v906_v29 = vpop.permute.xlu0 %905  ;;  %938 = vst [vmem:[#allocation2 + $0xd0] sm:$0xff] %v934_v23 }
 0x182   :  { %v911_v30 = vsel %vm907_vm12, %v2777_v24, %v906_v29  ;;  %v923_v31 = vsel %vm907_vm12, %v906_v29, 0.0 }
 0x183   :  { %856 = vrot.lane.b32.xlu0 %v2524_v39, %s2338_s8  ;;  %854 = vrot.lane.b32.xlu2 %v2519_v38, %s2338_s8  ;;  %v346_v38 = vld [vmem:[%s3389_s2 + $0x20] sm:$0xff]  ;;  %v930_v40 = vmul.f32 %v2643_v28, %v911_v30  ;;  %v931_v41 = vmul.f32 %v2653_v44, %v923_v31  ;;  %v2213_v45 = vpop.permute.xlu1 %2212 }
 0x184   :  { %1904 = vmatmul.msk.f32.vlgmr.msrb.gmra.mxu3 %vm275_vm7, %v2708_v43  ;;  %381 = vmatpush.msrb.mxu2 %v346_v38  ;;  %v2129_v43 = vld [vmem:[#allocation2 + $0x34] sm:$0xf0]  ;;  %v2214_v26 = vunpack.i.l.bf16 %v2213_v45 }
 0x185   :  { %v1971_v17 = vor.u32 %v2129_v43, %v1970_v8  ;;  %v2058_v21 = vld [vmem:[#allocation2 + $0xe0] sm:$0xf]  ;;  %v935_v46 = vpack.c.bf16 %v931_v41, %v930_v40 }
 0x186   :  { %1325 = vmatpush.bf16.msra.mxu2 %v2067_v7  ;;  %v2059_v27 = vor.u32 %v2151_v25, %v2058_v21  ;;  %v724_v49 = vsel %vm275_vm7, 0.0, %v2214_v26 }
 0x187   :  { %1310 = vmatpush.bf16.msrb.mxu1 %v1971_v17  ;;  %939 = vst [vmem:[#allocation2 + $0xd8] sm:$0xff] %v935_v46  ;;  %v2127_v10 = vld [vmem:[#allocation2 + $0x24] sm:$0xf0]  ;;  %v1964_v16 = vld [vmem:[#allocation2 + $0x28] sm:$0xf0] }
 0x188   :  { %2159 = vmatpush.bf16.msra.mxu3 %v2059_v27  ;;  %v2050_v56 = vld [vmem:[#allocation2 + $0xd0] sm:$0xf] }
 0x189   :  { %v656_v50 = vpop.permute.xlu0 %655 }
 0x18a   :  { %1326 = vmatpush.bf16.msra.mxu2 %v2059_v27  ;;  %v678_v51 = vsel %vm663_vm13, 0.0, %v656_v50 }
 0x18b   :  { %846 = vrot.lane.b32.xlu0 %v2495_v34, %s2338_s8  ;;  %844 = vrot.lane.b32.xlu2 %v2488_v33, %s2338_s8  ;;  %v2215_v33 = vunpack.i.h.bf16 %v2213_v45  ;;  %v684_v53 = vmul.f32 %v2643_v28, %v678_v51  ;;  %v658_v54 = vpop.permute.xlu1 %657 }
 0x18c   :  { %1905 = vmatmul.msk.f32.gmra.mxu3 %vm275_vm7, %v2733_v13  ;;  %v660_v13 = vpop.permute.xlu2 %659  ;;  %v666_v55 = vsel %vm663_vm13, %v656_v50, %v658_v54 }
 0x18d   :  { %v712_v48 = vsel %vm275_vm7, %v2214_v26, %v2215_v33  ;;  %v685_v58 = vmul.f32 %v2653_v44, %v666_v55 }
 0x18e   :  { %v728_v24 = vpack.c.bf16 %v712_v48, %v724_v49  ;;  %v2149_v59 = vld [vmem:[#allocation2 + $0xd4] sm:$0xf0] }
 0x18f   :  { %v2051_v62 = vor.u32 %v2149_v59, %v2050_v56 }
 0x190   :  { %732 = vst [vmem:[#allocation2 + $0x20] sm:$0xff] %v728_v24 }
 0x191   :  { %v662_v38 = vpop.permute.xlu0 %661  ;;  %1327 = vmatpush.bf16.msra.mxu2 %v2051_v62  ;;  %2160 = vmatpush.bf16.msra.mxu3 %v2051_v62 }
 0x192   :  { %v667_v0 = vsel %vm663_vm13, %v660_v13, %v662_v38 }
 0x193   :  { %991 = vrot.lane.b32.xlu0 %v2512_v37, %s2340_s13  ;;  %989 = vrot.lane.b32.xlu2 %v2507_v36, %s2340_s13  ;;  %v679_v37 = vsel %vm663_vm13, 0.0, %v660_v13  ;;  %v690_v36 = vpack.c.bf16 %v685_v58, %v684_v53  ;;  %v892_v2 = vpop.permute.xlu1 %891  ;;  %v2152_v58 = vld [vmem:[#allocation2 + $0xf4] sm:$0xf] }
 0x194   :  { %1906 = vmatmul.msk.f32.gmra.mxu3 %vm275_vm7, %v2751_v47  ;;  %v894_v60 = vpop.permute.xlu2 %893  ;;  %v686_v63 = vmul.f32 %v2643_v28, %v679_v37  ;;  %v1922_v37 = vld [vmem:[%s3390_s4] sm:$0xf] }
 0x195   :  { %v920_v47 = vsel %vm907_vm12, %v894_v60, 0.0  ;;  %694 = vst [vmem:[#allocation2 + $0x10] sm:$0xff] %v690_v36 }
 0x196   :  { %v925_v1 = vmul.f32 %v2653_v44, %v920_v47 }
 0x197   :  { %v1962_v61 = vld [vmem:[#allocation2 + $0x20] sm:$0xf]  ;;  %v2126_v15 = vld [vmem:[#allocation2 + $0x24] sm:$0xf] }
 0x198   :  { %v1963_v14 = vor.u32 %v2127_v10, %v1962_v61 }
 0x199   :  { %v896_v7 = vpop.permute.xlu0 %895 }
 0x19a   :  { %1311 = vmatpush.bf16.msrb.mxu1 %v1963_v14  ;;  %v2894_v14 = vld [vmem:[%s3386_s0 + $0x28] sm:$0xff] }
 0x19b   :  { %981 = vrot.lane.b32.xlu0 %v2483_v32, %s2340_s13  ;;  %995 = vrot.lane.b32.xlu2 %v2524_v39, %s2340_s13  ;;  %v687_v32 = vmul.f32 %v2653_v44, %v667_v0  ;;  %v908_v39 = vsel %vm907_vm12, %v892_v2, %v894_v60  ;;  %v898_v8 = vpop.permute.xlu1 %897  ;;  %v2068_v60 = vld [vmem:[#allocation2 + $0xf8] sm:$0xf0] }
 0x19c   :  { %1907 = vmatmul.msk.f32.gmra.mxu3 %vm275_vm7, %v2765_v9  ;;  %v924_v6 = vmul.f32 %v2643_v28, %v908_v39  ;;  %v909_v43 = vsel %vm907_vm12, %v896_v7, %v898_v8  ;;  %v921_v52 = vsel %vm907_vm12, %v898_v8, 0.0  ;;  %v2124_v20 = vld [vmem:[#allocation2 + $0x14] sm:$0xf]  ;;  %v2071_v38 = vor.u32 %v2152_v58, %v2068_v60 }
 0x19d   :  { %v691_v4 = vpack.c.bf16 %v687_v32, %v686_v63  ;;  %v926_v11 = vmul.f32 %v2643_v28, %v909_v43  ;;  %v927_v12 = vmul.f32 %v2653_v44, %v921_v52  ;;  %v2060_v32 = vld [vmem:[#allocation2 + $0xe8] sm:$0xf0]  ;;  %v2148_v39 = vld [vmem:[#allocation2 + $0xd4] sm:$0xf] }
 0x19e   :  { %v932_v9 = vpack.c.bf16 %v925_v1, %v924_v6  ;;  %v2150_v1 = vld [vmem:[#allocation2 + $0xe4] sm:$0xf]  ;;  %v2879_v52 = vld [vmem:[%s3387_s5 + $0x10] sm:$0xff] }
 0x19f   :  { %695 = vst [vmem:[#allocation2 + $0x18] sm:$0xff] %v691_v4  ;;  %v933_v17 = vpack.c.bf16 %v927_v12, %v926_v11  ;;  %v2063_v2 = vor.u32 %v2150_v1, %v2060_v32  ;;  %v2052_v4 = vld [vmem:[#allocation2 + $0xd8] sm:$0xf0] }
 0x1a0   :  { %936 = vst [vmem:[#allocation2 + $0xc0] sm:$0xff] %v932_v9  ;;  %v2341_v9 = vmov 1   ;;  %v2055_v8 = vor.u32 %v2148_v39, %v2052_v4 }
 0x1a1   :  { %937 = vst [vmem:[#allocation2 + $0xc8] sm:$0xff] %v933_v17  ;;  %v650_v30 = vpop.permute.xlu0 %649  ;;  %2221 = vset.pattern.permute.xlu2 %v2341_v9  ;;  %2223 = vset.pattern.permute.xlu1 %v2341_v9 }
 0x1a2   :  { %1083 = vperm.xlu1 %2223, %v2879_v52  }
 0x1a3   :  { %987 = vrot.lane.b32.xlu0 %v2500_v35, %s2340_s13  ;;  %985 = vrot.lane.b32.xlu2 %v2495_v34, %s2340_s13  ;;  %v1967_v35 = vor.u32 %v2126_v15, %v1964_v16  ;;  %v1954_v34 = vld [vmem:[#allocation2 + $0x10] sm:$0xf]  ;;  %v652_v26 = vpop.permute.xlu1 %651 }
 0x1a4   :  { %v677_v46 = vsel %vm663_vm13, 0.0, %v652_v26  ;;  %v2901_v16 = vld [vmem:[%s3386_s0 + $0x30] sm:$0xff] }
 0x1a5   :  { %1368 = vmatpush.bf16.msra.mxu0 %v1967_v35  ;;  %v682_v48 = vmul.f32 %v2643_v28, %v677_v46  ;;  %v2906_v35 = vld [vmem:[%s3386_s0 + $0x38] sm:$0xff] }
 0x1a6   :  { %v2125_v19 = vld [vmem:[#allocation2 + $0x14] sm:$0xf0]  ;;  %v1956_v22 = vld [vmem:[#allocation2 + $0x18] sm:$0xf0]  ;;  %v837_v17 = vpack.c.bf16 %v2906_v35, %v2901_v16 }
 0x1a7   :  { %v1955_v21 = vor.u32 %v2125_v19, %v1954_v34  ;;  %v1959_v3 = vor.u32 %v2124_v20, %v1956_v22  ;;  %v2042_v23 = vld [vmem:[#allocation2 + $0xc0] sm:$0xf]  ;;  %v2146_v61 = vld [vmem:[#allocation2 + $0xc4] sm:$0xf] }
 0x1a8   :  { %v2147_v25 = vld [vmem:[#allocation2 + $0xc4] sm:$0xf0]  ;;  %v2044_v10 = vld [vmem:[#allocation2 + $0xc8] sm:$0xf0]  ;;  %v2120_v22 = vld [vmem:[%s3390_s4 + $0x20] sm:$0xf0] }
 0x1a9   :  { %1312 = vmatpush.bf16.msrb.mxu1 %v1955_v21  ;;  %1369 = vmatpush.bf16.msra.mxu0 %v1959_v3  ;;  %v2043_v29 = vor.u32 %v2147_v25, %v2042_v23  ;;  %v2047_v20 = vor.u32 %v2146_v61, %v2044_v10  ;;  %v1934_v21 = vld [vmem:[%s3390_s4 + $0x18] sm:$0xf]  ;;  %841 = vst [vmem:[#allocation2 + $0x98] sm:$0xff] %v837_v17  ;;  %v2923_v25 = vld [vmem:[%s3386_s0] sm:$0xff] }
 0x1ab   :  { %1328 = vmatpush.bf16.msra.mxu2 %v2043_v29  ;;  %2161 = vmatpush.bf16.msra.mxu3 %v2043_v29  ;;  %v2858_v56 = vpop.permute.xlu1 %852  ;;  %v2928_v29 = vld [vmem:[%s3386_s0 + $0x8] sm:$0xff] }
 0x1ac   :  { %1087 = vperm.xlu2 %2221, %v2559_v57   ;;  %v2889_v57 = vld [vmem:[%s3386_s0 + $0x20] sm:$0xff]  ;;  %v873_v23 = vsel %vm858_vm14, %v2858_v56, 0.0 }
 0x1ad   :  { %v836_v15 = vpack.c.bf16 %v2894_v14, %v2889_v57 }
 0x1af   :  { %840 = vst [vmem:[#allocation2 + $0x90] sm:$0xff] %v836_v15 }
 0x1b3   :  { %v843_v6 = vpop.permute.xlu1 %842 }
 0x1bd   :  { %v351_v27 = vpop.permute.xlu2 %350 }
 0x1be   :  { %1908 = vmatmul.msk.f32.vlgmr.msrb.gmra.mxu2 %vm275_vm7, %v351_v27  ;;  %1912 = vmatmul.msk.f32.vlgmr.msrb.gmra.mxu0 %vm275_vm7, %v351_v27  ;;  %v834_v27 = vpack.c.bf16 %v2928_v29, %v2923_v25 }
 0x1c0   :  { %838 = vst [vmem:[#allocation2 + $0x80] sm:$0xff] %v834_v27 }
 0x1c5   :  { %v648_v31 = vpop.permute.xlu2 %647 }
 0x1c6   :  { %v676_v40 = vsel %vm663_vm13, 0.0, %v648_v31  ;;  %v664_v41 = vsel %vm663_vm13, %v648_v31, %v650_v30  ;;  %v2935_v30 = vld [vmem:[%s3386_s0 + $0x10] sm:$0xff]  ;;  %v2940_v31 = vld [vmem:[%s3386_s0 + $0x18] sm:$0xff] }
 0x1c7   :  { %v680_v45 = vmul.f32 %v2643_v28, %v676_v40  ;;  %v681_v33 = vmul.f32 %v2653_v44, %v664_v41  ;;  %v2117_v28 = vld [vmem:[%s3390_s4 + $0x8] sm:$0xf0]  ;;  %v835_v40 = vpack.c.bf16 %v2940_v31, %v2935_v30  ;;  %v2944_v41 = vor.u32 %v2120_v22, %v1934_v21  ;;  %v2141_v22 = vld [vmem:[#allocation2 + $0x94] sm:$0xf0] }
 0x1c8   :  { %v2866_v47 = vor.u32 %v2117_v28, %v1922_v37 }
 0x1c9   :  { %v688_v13 = vpack.c.bf16 %v681_v33, %v680_v45  ;;  %v849_v45 = vpop.permute.xlu1 %848  ;;  %v2342_v33 = vmov 2   ;;  %839 = vst [vmem:[#allocation2 + $0x88] sm:$0xff] %v835_v40 }
 0x1ca   :  { %2222 = vset.pattern.permute.xlu0 %v2342_v33  ;;  %2224 = vset.pattern.permute.xlu2 %v2342_v33 }
 0x1cb   :  { %692 = vst [vmem:[#allocation2] sm:$0xff] %v688_v13  ;;  %561 = vperm.xlu2 %2224, %v2879_v52  }
 0x1cd   :  { %v654_v49 = vpop.permute.xlu2 %653 }
 0x1ce   :  { %v665_v24 = vsel %vm663_vm13, %v652_v26, %v654_v49  ;;  %v880_v26 = vmul.f32 %v2691_v18, %v873_v23  ;;  %v2020_v23 = vld [vmem:[#allocation2 + $0x98] sm:$0xf0] }
 0x1cf   :  { %v683_v50 = vmul.f32 %v2653_v44, %v665_v24 }
 0x1d1   :  { %v689_v51 = vpack.c.bf16 %v683_v50, %v682_v48  ;;  %v2320_v48 = vld [vmem:[%s3387_s5 + $0x18] sm:$0xff] }
 0x1d2   :  { %v1946_v54 = vld [vmem:[#allocation2] sm:$0xf]  ;;  %v2122_v55 = vld [vmem:[#allocation2 + $0x4] sm:$0xf]  ;;  %565 = vperm.xlu0 %2222, %v2320_v48  }
 0x1d3   :  { %693 = vst [vmem:[#allocation2 + $0x8] sm:$0xff] %v689_v51  ;;  %v994_v51 = vpop.permute.xlu1 %993  ;;  %2226 = vset.pattern.permute.xlu2 %v2341_v9 }
 0x1d5   :  { %v2856_v53 = vpop.permute.xlu2 %356 }
 0x1da   :  { %v2123_v59 = vld [vmem:[#allocation2 + $0x4] sm:$0xf0]  ;;  %v1948_v44 = vld [vmem:[#allocation2 + $0x8] sm:$0xf0]  ;;  %2229 = vset.pattern.permute.xlu0 %v2341_v9 }
 0x1db   :  { %v1947_v36 = vor.u32 %v2123_v59, %v1946_v54  ;;  %v1951_v62 = vor.u32 %v2122_v55, %v1948_v44  ;;  %v984_v17 = vpop.permute.xlu1 %983 }
 0x1dd   :  { %v353_v63 = vpop.permute.xlu0 %352  ;;  %1313 = vmatpush.bf16.msrb.mxu1 %v1947_v36  ;;  %1370 = vmatpush.bf16.msra.mxu0 %v1951_v62  ;;  %v2868_v0 = vpop.permute.xlu2 %854  ;;  %v2974_v36 = vld [vmem:[%s3387_s5 + $0x8] sm:$0xff] }
 0x1de   :  { %1909 = vmatmul.msk.f32.gmra.mxu2 %vm275_vm7, %v353_v63  ;;  %1913 = vmatmul.msk.f32.gmra.mxu0 %vm275_vm7, %v353_v63  ;;  %v2343_v63 = vmov 3  }
 0x1df   :  { %1079 = vperm.xlu2 %2226, %v2974_v36   ;;  %2225 = vset.pattern.permute.xlu1 %v2343_v63 }
 0x1e0   :  { %1314 = vmatmul.bf16.vlgmr.msrb.gmra.mxu1 %v2866_v47  ;;  %589 = vperm.xlu1 %2225, %v2320_v48  }
 0x1e1   :  { %1382 = vmatpush.bf16.msra.mxu1 %v2071_v38  ;;  %v872_v38 = vsel %vm858_vm14, %v849_v45, 0.0 }
 0x1e5   :  { %1383 = vmatpush.bf16.msra.mxu1 %v2063_v2  ;;  %v355_v7 = vpop.permute.xlu0 %354  ;;  %v845_v43 = vpop.permute.xlu2 %844 }
 0x1e6   :  { %1910 = vmatmul.msk.f32.gmra.mxu2 %vm275_vm7, %v355_v7  ;;  %1914 = vmatmul.msk.f32.gmra.mxu0 %vm275_vm7, %v355_v7  ;;  %v859_v11 = vsel %vm858_vm14, %v843_v6, %v845_v43  ;;  %v871_v12 = vsel %vm858_vm14, %v845_v43, 0.0 }
 0x1e7   :  { %v875_v34 = vmul.f32 %v2675_v5, %v859_v11  ;;  %v876_v19 = vmul.f32 %v2691_v18, %v871_v12  ;;  %2228 = vset.pattern.permute.xlu2 %v2343_v63 }
 0x1e8   :  { %585 = vperm.xlu2 %2228, %v2879_v52   ;;  %2227 = vset.pattern.permute.xlu1 %v2342_v33 }
 0x1e9   :  { %1384 = vmatpush.bf16.msra.mxu1 %v2055_v8  ;;  %v883_v3 = vpack.c.bf16 %v876_v19, %v875_v34  ;;  %557 = vperm.xlu1 %2227, %v2974_v36  }
 0x1eb   :  { %887 = vst [vmem:[#allocation2 + $0xa0] sm:$0xff] %v883_v3  ;;  %v2140_v3 = vld [vmem:[#allocation2 + $0x94] sm:$0xf] }
 0x1ed   :  { %1385 = vmatpush.bf16.msra.mxu1 %v2047_v20  ;;  %v851_v13 = vpop.permute.xlu0 %850  ;;  %v990_v46 = vpop.permute.xlu2 %989  ;;  %v2018_v20 = vld [vmem:[#allocation2 + $0x90] sm:$0xf] }
 0x1ee   :  { %v861_v49 = vsel %vm858_vm14, %v851_v13, %v2858_v56  ;;  %1911 = vmatmul.msk.f32.gmra.mxu2 %vm275_vm7, %v2856_v53  ;;  %1915 = vmatmul.msk.f32.gmra.mxu0 %vm275_vm7, %v2856_v53  ;;  %v2019_v13 = vor.u32 %v2141_v22, %v2018_v20  ;;  %v1942_v22 = vld [vmem:[%s3390_s4 + $0x20] sm:$0xf] }
 0x1ef   :  { %v879_v24 = vmul.f32 %v2675_v5, %v861_v49  ;;  %v2010_v49 = vld [vmem:[#allocation2 + $0x80] sm:$0xf] }
 0x1f0   :  { %1319 = vmatmul.bf16.gmra.mxu1 %v2944_v41 }
 0x1f1   :  { %v885_v50 = vpack.c.bf16 %v880_v26, %v879_v24 }
 0x1f2   :  { %v2026_v34 = vld [vmem:[#allocation2 + $0xa0] sm:$0xf]  ;;  %v2142_v19 = vld [vmem:[#allocation2 + $0xa4] sm:$0xf] }
 0x1f3   :  { %889 = vst [vmem:[#allocation2 + $0xb0] sm:$0xff] %v885_v50  ;;  %v2139_v50 = vld [vmem:[#allocation2 + $0x84] sm:$0xf0] }
 0x1f5   :  { %v857_v54 = vpop.permute.xlu0 %856  ;;  %v996_v55 = vpop.permute.xlu2 %995 }
 0x1f6   :  { %v874_v56 = vsel %vm858_vm14, %v857_v54, 0.0  ;;  %v862_v58 = vsel %vm858_vm14, %v2868_v0, %v857_v54  ;;  %1371 = vmatmul.bf16.vlgmr.msra.gmra.mxu0 %v2866_v47  ;;  %v1001_v53 = vsel %vm997_vm15, %v994_v51, %v996_v55  ;;  %v1013_v37 = vsel %vm997_vm15, %v996_v55, 0.0  ;;  %v2138_v51 = vld [vmem:[#allocation2 + $0x84] sm:$0xf]  ;;  %v2012_v54 = vld [vmem:[#allocation2 + $0x88] sm:$0xf0] }
 0x1f7   :  { %v882_v28 = vmul.f32 %v2691_v18, %v874_v56  ;;  %v881_v59 = vmul.f32 %v2675_v5, %v862_v58  ;;  %v1020_v60 = vmul.f32 %v2675_v5, %v1001_v53  ;;  %v1021_v44 = vmul.f32 %v2691_v18, %v1013_v37 }
 0x1f8   :  { %v878_v0 = vmul.f32 %v2691_v18, %v872_v38  ;;  %v2011_v37 = vor.u32 %v2139_v50, %v2010_v49 }
 0x1f9   :  { %v886_v62 = vpack.c.bf16 %v882_v28, %v881_v59  ;;  %v1025_v47 = vpack.c.bf16 %v1021_v44, %v1020_v60  ;;  %v2015_v28 = vor.u32 %v2138_v51, %v2012_v54  ;;  %v2116_v59 = vld [vmem:[%s3390_s4 + $0x4] sm:$0xf]  ;;  %v1924_v60 = vld [vmem:[%s3390_s4 + $0xc] sm:$0xf0]  ;;  %v2119_v44 = vld [vmem:[%s3390_s4 + $0x1c] sm:$0xf] }
 0x1fa   :  { %v2034_v39 = vld [vmem:[#allocation2 + $0xb0] sm:$0xf]  ;;  %v2144_v4 = vld [vmem:[#allocation2 + $0xb4] sm:$0xf] }
 0x1fb   :  { %890 = vst [vmem:[#allocation2 + $0xb8] sm:$0xff] %v886_v62  ;;  %v1936_v62 = vld [vmem:[%s3390_s4 + $0x24] sm:$0xf0] }
 0x1fc   :  { %1029 = vst [vmem:[#allocation2 + $0x118] sm:$0xff] %v1025_v47 }
 0x1fd   :  { %v847_v1 = vpop.permute.xlu0 %846 }
 0x1fe   :  { %v860_v32 = vsel %vm858_vm14, %v847_v1, %v849_v45  ;;  %v1010_v45 = vsel %vm997_vm15, %v984_v17, 0.0 }
 0x1ff   :  { %v877_v2 = vmul.f32 %v2675_v5, %v860_v32  ;;  %v1015_v48 = vmul.f32 %v2691_v18, %v1010_v45 }
 0x201   :  { %v884_v6 = vpack.c.bf16 %v878_v0, %v877_v2  ;;  %v986_v0 = vpop.permute.xlu2 %985  ;;  %v1927_v2 = vor.u32 %v2116_v59, %v1924_v60 }
 0x202   :  { %v2145_v7 = vld [vmem:[#allocation2 + $0xb4] sm:$0xf0]  ;;  %v2036_v8 = vld [vmem:[#allocation2 + $0xb8] sm:$0xf0] }
 0x203   :  { %888 = vst [vmem:[#allocation2 + $0xa8] sm:$0xff] %v884_v6  ;;  %v2035_v43 = vor.u32 %v2145_v7, %v2034_v39  ;;  %v2039_v61 = vor.u32 %v2144_v4, %v2036_v8  ;;  %v2157_v56 = vld [vmem:[#allocation2 + $0x114] sm:$0xf0]  ;;  %v2084_v58 = vld [vmem:[#allocation2 + $0x118] sm:$0xf0]  ;;  %v305_v39 = vpop.f32.mrf.mxu3  ;;  %v1939_v6 = vor.u32 %v2119_v44, %v1936_v62 }
 0x205   :  { %v992_v10 = vpop.permute.xlu0 %991  ;;  %1329 = vmatpush.bf16.msra.mxu2 %v2035_v43  ;;  %2162 = vmatpush.bf16.msra.mxu3 %v2035_v43 }
 0x206   :  { %v1012_v11 = vsel %vm997_vm15, %v992_v10, 0.0  ;;  %v1000_v12 = vsel %vm997_vm15, %v990_v46, %v992_v10  ;;  %1376 = vmatmul.bf16.gmra.mxu0 %v2944_v41  ;;  %1386 = vmatpush.bf16.msra.mxu1 %v2039_v61  ;;  %v2023_v46 = vor.u32 %v2140_v3, %v2020_v23  ;;  %v2121_v3 = vld [vmem:[%s3390_s4 + $0x28] sm:$0xf0] }
 0x207   :  { %v1019_v52 = vmul.f32 %v2691_v18, %v1012_v11  ;;  %v1018_v15 = vmul.f32 %v2675_v5, %v1000_v12 }
 0x209   :  { %v1024_v21 = vpack.c.bf16 %v1019_v52, %v1018_v15  ;;  %v1930_v15 = vld [vmem:[%s3390_s4 + $0x8] sm:$0xf] }
 0x20a   :  { %v2143_v27 = vld [vmem:[#allocation2 + $0xa4] sm:$0xf0]  ;;  %v2028_v40 = vld [vmem:[#allocation2 + $0xa8] sm:$0xf0] }
 0x20b   :  { %1028 = vst [vmem:[#allocation2 + $0x110] sm:$0xff] %v1024_v21  ;;  %v2027_v33 = vor.u32 %v2143_v27, %v2026_v34  ;;  %v2031_v41 = vor.u32 %v2142_v19, %v2028_v40  ;;  %v308_v11 = vpop.f32.mrf.mxu3  ;;  %v1943_v27 = vor.u32 %v2121_v3, %v1942_v22 }
 0x20d   :  { %v982_v26 = vpop.permute.xlu0 %981  ;;  %1330 = vmatpush.bf16.msra.mxu2 %v2027_v33  ;;  %1387 = vmatpush.bf16.msra.mxu1 %v2031_v41 }
 0x20e   :  { %2163 = vmatpush.bf16.msra.mxu3 %v2027_v33  ;;  %v998_v24 = vsel %vm997_vm15, %v982_v26, %v984_v17  ;;  %v2118_v17 = vld [vmem:[%s3390_s4 + $0x10] sm:$0xf0] }
 0x20f   :  { %v1014_v55 = vmul.f32 %v2675_v5, %v998_v24  ;;  %v1931_v20 = vor.u32 %v2118_v17, %v1930_v15 }
 0x211   :  { %1331 = vmatpush.bf16.msra.mxu2 %v2019_v13  ;;  %1388 = vmatpush.bf16.msra.mxu1 %v2023_v46  ;;  %v1022_v53 = vpack.c.bf16 %v1015_v48, %v1014_v55 }
 0x212   :  { %2164 = vmatpush.bf16.msra.mxu3 %v2019_v13  ;;  %v2082_v47 = vld [vmem:[#allocation2 + $0x110] sm:$0xf]  ;;  %v2156_v38 = vld [vmem:[#allocation2 + $0x114] sm:$0xf] }
 0x213   :  { %1026 = vst [vmem:[#allocation2 + $0x100] sm:$0xff] %v1022_v53  ;;  %v2083_v1 = vor.u32 %v2157_v56, %v2082_v47  ;;  %v2087_v32 = vor.u32 %v2156_v38, %v2084_v58  ;;  %v311_v21 = vpop.f32.mrf.mxu3 }
 0x215   :  { %v988_v4 = vpop.permute.xlu0 %987  ;;  %1332 = vmatpush.bf16.msra.mxu2 %v2011_v37  ;;  %1389 = vmatpush.bf16.msra.mxu1 %v2015_v28 }
 0x216   :  { %v1011_v7 = vsel %vm997_vm15, %v988_v4, 0.0  ;;  %v999_v8 = vsel %vm997_vm15, %v986_v0, %v988_v4  ;;  %2165 = vmatpush.bf16.msra.mxu3 %v2011_v37 }
 0x217   :  { %v1017_v43 = vmul.f32 %v2691_v18, %v1011_v7  ;;  %v1016_v61 = vmul.f32 %v2675_v5, %v999_v8 }
 0x218   :  { %1333 = vmatmul.bf16.vlgmr.msra.gmra.mxu2 %v1927_v2  ;;  %1390 = vmatmul.bf16.vlgmr.msra.gmra.mxu1 %v1927_v2 }
 0x219   :  { %1350 = vmatpush.bf16.msrb.mxu2 %v2083_v1  ;;  %v1023_v10 = vpack.c.bf16 %v1017_v43, %v1016_v61  ;;  %1338 = vmatmul.bf16.vlgmr.msra.gmra.mxu3 %v1939_v6 }
 0x21a   :  { %1407 = vmatpush.bf16.msrb.mxu3 %v2087_v32  ;;  %v2074_v12 = vld [vmem:[#allocation2 + $0x100] sm:$0xf]  ;;  %v2154_v52 = vld [vmem:[#allocation2 + $0x104] sm:$0xf] }
 0x21b   :  { %1027 = vst [vmem:[#allocation2 + $0x108] sm:$0xff] %v1023_v10  ;;  %v314_v23 = vpop.f32.mrf.mxu3 }
 0x222   :  { %v2155_v18 = vld [vmem:[#allocation2 + $0x104] sm:$0xf0]  ;;  %v2076_v34 = vld [vmem:[#allocation2 + $0x108] sm:$0xf0] }
 0x223   :  { %v2075_v5 = vor.u32 %v2155_v18, %v2074_v12  ;;  %v2079_v19 = vor.u32 %v2154_v52, %v2076_v34  ;;  %v334_v45 = vpop.f32.mrf.mxu3 }
 0x225   :  { %1351 = vmatpush.bf16.msrb.mxu2 %v2075_v5  ;;  %1408 = vmatpush.bf16.msrb.mxu3 %v2079_v19 }
 0x228   :  { %2088 = vmatmul.msk.bf16.vlgmr.msrb.gmra.mxu2 %vm153_vm0, %v1931_v20  ;;  %1395 = vmatmul.bf16.gmra.mxu1 %v1939_v6 }
 0x229   :  { %2090 = vmatmul.msk.bf16.vlgmr.msrb.gmra.mxu3 %vm153_vm0, %v1931_v20 }
 0x22b   :  { %v337_v51 = vpop.f32.mrf.mxu3 }
 0x233   :  { %v340_v53 = vpop.f32.mrf.mxu3 }
 0x238   :  { %2089 = vmatmul.msk.bf16.gmra.mxu2 %vm153_vm0, %v1943_v27 }
 0x239   :  { %2091 = vmatmul.msk.bf16.gmra.mxu3 %vm153_vm0, %v1943_v27 }
 0x23b   :  { %v412_v40 = vpop.f32.mrf.mxu0 }
 0x23c   :  { %v425_v33 = vmul.f32 %v412_v40, %v334_v45 }
 0x23e   :  { %v3027_v26 = vmul.f32 %v2928_v29, %v425_v33  ;;  %v3038_v29 = vpop.permute.xlu2 %1087 }
 0x240   :  { %v457_v24 = vmul.f32 %v3027_v26, %v3027_v26 }
 0x241   :  { %v383_v41 = vpop.f32.mrf.mxu2 }
 0x242   :  { %v424_v13 = vmul.f32 %v383_v41, %v305_v39  ;;  %v343_v39 = vpop.f32.mrf.mxu3 }
 0x244   :  { %v3030_v46 = vmul.f32 %v2923_v25, %v424_v13 }
 0x246   :  { %v440_v48 = vadd.f32 %v3027_v26, %v3030_v46  ;;  %v456_v49 = vmul.f32 %v3030_v46, %v3030_v46  ;;  %v3048_v60 = vpop.permute.xlu2 %561 }
 0x248   :  { %441 = vadd.xlane.f32.xlu2 %v440_v48  ;;  %v464_v50 = vadd.f32 %v457_v24, %v456_v49  ;;  %v1084_v48 = vpop.permute.xlu1 %1083 }
 0x24a   :  { %465 = vadd.xlane.f32.xlu1 %v464_v50 }
 0x25b   :  { %v415_v54 = vpop.f32.mrf.mxu0 }
 0x25c   :  { %v427_v55 = vmul.f32 %v415_v54, %v337_v51 }
 0x25d   :  { %v3046_v59 = vpop.f32.mrf.mxu1 }
 0x25e   :  { %v3041_v25 = vmul.f32 %v2940_v31, %v427_v55 }
 0x260   :  { %v459_v31 = vmul.f32 %v3041_v25, %v3041_v25 }
 0x261   :  { %v386_v56 = vpop.f32.mrf.mxu2 }
 0x262   :  { %v426_v58 = vmul.f32 %v386_v56, %v308_v11 }
 0x263   :  { %v418_v37 = vpop.f32.mrf.mxu0 }
 0x264   :  { %v3044_v28 = vmul.f32 %v2935_v30, %v426_v58  ;;  %v429_v44 = vmul.f32 %v418_v37, %v340_v53 }
 0x265   :  { %v1317_v6 = vpop.f32.mrf.mxu1 }
 0x266   :  { %v443_v62 = vadd.f32 %v3041_v25, %v3044_v28  ;;  %v458_v47 = vmul.f32 %v3044_v28, %v3044_v28  ;;  %v3057_v30 = vmul.f32 %v2894_v14, %v429_v44  ;;  %v1080_v14 = vpop.permute.xlu2 %1079 }
 0x267   :  { %v1318_v61 = vadd.f32 %v1317_v6, %v1080_v14 }
 0x268   :  { %444 = vadd.xlane.f32.xlu2 %v443_v62  ;;  %v467_v38 = vadd.f32 %v459_v31, %v458_v47  ;;  %v461_v43 = vmul.f32 %v3057_v30, %v3057_v30 }
 0x269   :  { %v389_v0 = vpop.f32.mrf.mxu2 }
 0x26a   :  { %v428_v1 = vmul.f32 %v389_v0, %v311_v21  ;;  %468 = vadd.xlane.f32.xlu0 %v467_v38 }
 0x26b   :  { %v421_v32 = vpop.f32.mrf.mxu0 }
 0x26c   :  { %v3060_v2 = vmul.f32 %v2889_v57, %v428_v1  ;;  %v431_v4 = vmul.f32 %v421_v32, %v343_v39 }
 0x26d   :  { %v1320_v20 = vpop.f32.mrf.mxu1 }
 0x26e   :  { %v446_v7 = vadd.f32 %v3057_v30, %v3060_v2  ;;  %v460_v8 = vmul.f32 %v3060_v2, %v3060_v2  ;;  %v3069_v57 = vmul.f32 %v2906_v35, %v431_v4  ;;  %v1321_v54 = vadd.f32 %v1320_v20, %v1084_v48 }
 0x270   :  { %447 = vadd.xlane.f32.xlu2 %v446_v7  ;;  %v470_v10 = vadd.f32 %v461_v43, %v460_v8  ;;  %v463_v18 = vmul.f32 %v3069_v57, %v3069_v57 }
 0x271   :  { %v392_v11 = vpop.f32.mrf.mxu2 }
 0x272   :  { %v430_v12 = vmul.f32 %v392_v11, %v314_v23  ;;  %471 = vadd.xlane.f32.xlu1 %v470_v10  ;;  %v3118_v10 = vpop.permute.xlu2 %585 }
 0x273   :  { %v3071_v52 = vpop.f32.mrf.mxu0 }
 0x274   :  { %v3074_v15 = vmul.f32 %v2901_v16, %v430_v12  ;;  %v2322_v16 = vld [vmem:[%s3387_s5] sm:$0xff] }
 0x275   :  { %v1322_v21 = vpop.f32.mrf.mxu1 }
 0x276   :  { %v462_v17 = vmul.f32 %v3074_v15, %v3074_v15  ;;  %v449_v5 = vadd.f32 %v3069_v57, %v3074_v15  ;;  %v1323_v0 = vadd.f32 %v1322_v21, %v3038_v29 }
 0x278   :  { %v473_v34 = vadd.f32 %v463_v18, %v462_v17 }
 0x27a   :  { %474 = vadd.xlane.f32.xlu0 %v473_v34  ;;  %450 = vadd.xlane.f32.xlu1 %v449_v5 }
 0x27b   :  { %v1374_v35 = vpop.f32.mrf.mxu0 }
 0x27c   :  { %v1375_v19 = vadd.f32 %v1374_v35, %v1080_v14 }
 0x283   :  { %v1377_v24 = vpop.f32.mrf.mxu0 }
 0x284   :  { %v1378_v56 = vadd.f32 %v1377_v24, %v1084_v48 }
 0x288   :  { %581 = vperm.xlu2 %2228, %v2974_v36  }
 0x28b   :  { %v1379_v31 = vpop.f32.mrf.mxu0 }
 0x28c   :  { %v1380_v32 = vadd.f32 %v1379_v31, %v3038_v29  ;;  %v3120_v29 = vpop.permute.xlu0 %565 }
 0x28e   :  { %1075 = vperm.xlu0 %2229, %v2322_v16  }
 0x290   :  { %2232 = vset.pattern.permute.xlu2 %v2333_v42 }
 0x293   :  { %553 = vperm.xlu1 %2227, %v2322_v16  }
 0x295   :  { %v3087_v22 = vpop.f32.mrf.mxu1 }
 0x296   :  { %2231 = vset.pattern.permute.xlu0 %v2333_v42 }
 0x29b   :  { %v3090_v3 = vpop.f32.mrf.mxu2  ;;  %2230 = vset.pattern.permute.xlu1 %v2343_v63 }
 0x29c   :  { %v1339_v23 = vpop.f32.mrf.mxu3  ;;  %577 = vperm.xlu1 %2230, %v2322_v16  }
 0x29d   :  { %v1393_v36 = vpop.f32.mrf.mxu1  ;;  %v1340_v58 = vadd.f32 %v1339_v23, %v1321_v54 }
 0x29e   :  { %v1394_v27 = vadd.f32 %v1393_v36, %v1375_v19 }
 0x2a3   :  { %v1336_v40 = vpop.f32.mrf.mxu2 }
 0x2a4   :  { %v1337_v45 = vadd.f32 %v1336_v40, %v1318_v61  ;;  %v1341_v33 = vpop.f32.mrf.mxu3  ;;  %2233 = vset.pattern.permute.xlu1 %v2341_v9  ;;  %v3116_v61 = vpop.permute.xlu1 %589 }
 0x2a5   :  { %v1396_v55 = vpop.f32.mrf.mxu1  ;;  %v1342_v39 = vadd.f32 %v1341_v33, %v1323_v0 }
 0x2a6   :  { %v1397_v53 = vadd.f32 %v1396_v55, %v1378_v56 }
 0x2ab   :  { %v3094_v41 = vpop.f32.mrf.mxu2 }
 0x2ac   :  { %v3096_v13 = vpop.f32.mrf.mxu3  ;;  %v558_v11 = vpop.permute.xlu1 %557 }
 0x2ad   :  { %v1398_v1 = vpop.f32.mrf.mxu1 }
 0x2ae   :  { %v1399_v4 = vadd.f32 %v1398_v1, %v1380_v32 }
 0x2b3   :  { %v1355_v49 = vpop.f32.mrf.mxu2 }
 0x2b4   :  { %v3098_v50 = vadd.f32 %v1355_v49, %v1337_v45  ;;  %v1412_v51 = vpop.f32.mrf.mxu3 }
 0x2b5   :  { %v3100_v63 = vadd.f32 %v1412_v51, %v1394_v27 }
 0x2bb   :  { %v1358_v37 = vpop.f32.mrf.mxu2  ;;  %v442_v12 = vpop.xlane.xlu2 %441 }
 0x2bc   :  { %v3102_v44 = vadd.f32 %v1358_v37, %v1340_v58  ;;  %v1415_v62 = vpop.f32.mrf.mxu3  ;;  %v3122_v17 = vmul.f32 0.00390625, %v442_v12 }
 0x2bd   :  { %v3104_v47 = vadd.f32 %v1415_v62, %v1397_v53  ;;  %v466_v18 = vpop.xlane.xlu1 %465 }
 0x2be   :  { %v476_v19 = vmul.f32 0.00390625, %v466_v18  ;;  %v480_v20 = vmul.f32 %v3122_v17, %v3122_v17 }
 0x2bf   :  { %v1442_v38 = vadd.f32 %v3104_v47, %v3102_v44 }
 0x2c0   :  { %v484_v36 = vsub.f32 %v476_v19, %v480_v20 }
 0x2c1   :  { %1443 = vadd.xlane.f32.xlu2 %v1442_v38 }
 0x2c2   :  { %v488_v49 = vmax.f32 %v484_v36, 0.0 }
 0x2c3   :  { %v1360_v6 = vpop.f32.mrf.mxu2 }
 0x2c4   :  { %v3110_v7 = vadd.f32 %v1360_v6, %v1342_v39  ;;  %v1417_v8 = vpop.f32.mrf.mxu3  ;;  %v3130_v55 = vadd.f32 1e-05, %v488_v49 }
 0x2c5   :  { %v3112_v43 = vadd.f32 %v1417_v8, %v1399_v4 }
 0x2c6   :  { %vm510_vm12 = vweird.f32 %v3130_v55 }
 0x2c7   :  { %v1445_v14 = vadd.f32 %v3112_v43, %v3110_v7 }
 0x2c9   :  { %1446 = vadd.xlane.f32.xlu0 %v1445_v14 }
 0x2db   :  { %v445_v34 = vpop.xlane.xlu2 %444 }
 0x2dc   :  { %v453_v5 = vmul.f32 0.00390625, %v445_v34 }
 0x2dd   :  { %v469_v35 = vpop.xlane.xlu0 %468 }
 0x2de   :  { %v477_v21 = vmul.f32 0.00390625, %v469_v35  ;;  %v481_v16 = vmul.f32 %v453_v5, %v453_v5  ;;  %v494_v34 = vsub.f32 %v3044_v28, %v453_v5  ;;  %v495_v35 = vsub.f32 %v3041_v25, %v453_v5 }
 0x2e0   :  { %v485_v23 = vsub.f32 %v477_v21, %v481_v16 }
 0x2e2   :  { %v489_v27 = vmax.f32 %v485_v23, 0.0 }
 0x2e3   :  { %v448_v40 = vpop.xlane.xlu2 %447 }
 0x2e4   :  { %v501_v45 = vadd.f32 1e-05, %v489_v27  ;;  %v3126_v33 = vmul.f32 0.00390625, %v448_v40 }
 0x2e5   :  { %v472_v48 = vpop.xlane.xlu1 %471 }
 0x2e6   :  { %2255 = vrsqrt.f32 %v501_v45  ;;  %v478_v24 = vmul.f32 0.00390625, %v472_v48  ;;  %v482_v51 = vmul.f32 %v3126_v33, %v3126_v33  ;;  %vm520_vm2 = vweird.f32 %v501_v45 }
 0x2e7   :  { %2257 = vrsqrt.f32 %v3130_v55 }
 0x2e8   :  { %v486_v54 = vsub.f32 %v478_v24, %v482_v51 }
 0x2ea   :  { %v490_v56 = vmax.f32 %v486_v54, 0.0 }
 0x2eb   :  { %v582_v24 = vpop.permute.xlu2 %581 }
 0x2ec   :  { %v2256_v58 = vpop.eup %2255  ;;  %v502_v37 = vadd.f32 1e-05, %v490_v56 }
 0x2ed   :  { %v515_v53 = vmul.f32 %v2256_v58, %v501_v45  ;;  %v475_v62 = vpop.xlane.xlu0 %474  ;;  %v451_v31 = vpop.xlane.xlu1 %450  ;;  %vm521_vm7 = vweird.f32 %v2256_v58 }
 0x2ee   :  { %v3133_v38 = vmul.f32 0.00390625, %v451_v31  ;;  %2259 = vrsqrt.f32 %v502_v37  ;;  %v479_v1 = vmul.f32 0.00390625, %v475_v62  ;;  %v3137_v8 = vpop.eup %2257  ;;  %vm522_vm3 = vmor %vm520_vm2, %vm521_vm7  ;;  %vm530_vm5 = vweird.f32 %v502_v37 }
 0x2ef   :  { %v516_v0 = vmul.f32 %v2256_v58, %v515_v53  ;;  %v505_v21 = vmul.f32 %v3137_v8, %v3130_v55  ;;  %v497_v62 = vsub.f32 %v3057_v30, %v3126_v33  ;;  %vm511_vm11 = vweird.f32 %v3137_v8 }
 0x2f0   :  { %v483_v32 = vmul.f32 %v3133_v38, %v3133_v38  ;;  %vm512_vm13 = vmor %vm510_vm12, %vm511_vm11 }
 0x2f1   :  { %v517_v39 = vmul.f32 0.5, %v516_v0  ;;  %v506_v45 = vmul.f32 %v3137_v8, %v505_v21  ;;  %v499_v21 = vsub.f32 %v3069_v57, %v3133_v38 }
 0x2f2   :  { %v487_v4 = vsub.f32 %v479_v1, %v483_v32 }
 0x2f3   :  { %v518_v6 = vsub.f32 1.5, %v517_v39  ;;  %v507_v53 = vmul.f32 0.5, %v506_v45 }
 0x2f4   :  { %v491_v14 = vmax.f32 %v487_v4, 0.0  ;;  %v2260_v12 = vpop.eup %2259 }
 0x2f5   :  { %v519_v18 = vmul.f32 %v2256_v58, %v518_v6  ;;  %v525_v19 = vmul.f32 %v2260_v12, %v502_v37  ;;  %vm531_vm4 = vweird.f32 %v2260_v12 }
 0x2f6   :  { %v503_v20 = vadd.f32 1e-05, %v491_v14  ;;  %vm532_vm6 = vmor %vm530_vm5, %vm531_vm4 }
 0x2f7   :  { %v523_v16 = vsel %vm522_vm3, %v2256_v58, %v519_v18  ;;  %v526_v23 = vmul.f32 %v2260_v12, %v525_v19  ;;  %v496_v58 = vsub.f32 %v3060_v2, %v3126_v33 }
 0x2f8   :  { %v546_v36 = vmul.f32 %v523_v16, %v494_v34  ;;  %v547_v27 = vmul.f32 %v523_v16, %v495_v35  ;;  %2261 = vrsqrt.f32 %v503_v20  ;;  %v508_v34 = vsub.f32 1.5, %v507_v53 }
 0x2f9   :  { %v527_v40 = vmul.f32 0.5, %v526_v23  ;;  %vm540_vm9 = vweird.f32 %v503_v20  ;;  %v492_v23 = vsub.f32 %v3030_v46, %v3122_v17 }
 0x2fa   :  { %v570_v48 = vmul.f32 %v558_v11, %v546_v36  ;;  %v571_v49 = vmul.f32 %v558_v11, %v547_v27  ;;  %v493_v36 = vsub.f32 %v3027_v26, %v3122_v17 }
 0x2fb   :  { %v528_v28 = vsub.f32 1.5, %v527_v40 }
 0x2fc   :  { %v3144_v25 = vadd.f32 %v582_v24, %v570_v48  ;;  %v3146_v5 = vadd.f32 %v582_v24, %v571_v49  ;;  %v1439_v49 = vadd.f32 %v3100_v63, %v3098_v50 }
 0x2fd   :  { %v529_v56 = vmul.f32 %v2260_v12, %v528_v28 }
 0x2fe   :  { %v2262_v51 = vpop.eup %2261  ;;  %v1427_v54 = vadd.f32 %v3146_v5, %v3144_v25 }
 0x2ff   :  { %v535_v11 = vmul.f32 %v2262_v51, %v503_v20  ;;  %v533_v0 = vsel %vm532_vm6, %v2260_v12, %v529_v56  ;;  %vm541_vm8 = vweird.f32 %v2262_v51 }
 0x300   :  { %1428 = vadd.xlane.f32.xlu0 %v1427_v54  ;;  %v1076_v31 = vpop.permute.xlu0 %1075  ;;  %v548_v39 = vmul.f32 %v533_v0, %v496_v58  ;;  %v549_v4 = vmul.f32 %v533_v0, %v497_v62  ;;  %vm542_vm10 = vmor %vm540_vm9, %vm541_vm8 }
 0x301   :  { %v536_v1 = vmul.f32 %v2262_v51, %v535_v11  ;;  %v1316_v32 = vadd.f32 %v3046_v59, %v1076_v31  ;;  %v1373_v37 = vadd.f32 %v3071_v52, %v1076_v31 }
 0x302   :  { %v572_v18 = vmul.f32 %v3048_v60, %v548_v39  ;;  %v573_v30 = vmul.f32 %v3048_v60, %v549_v4  ;;  %v498_v60 = vsub.f32 %v3074_v15, %v3133_v38 }
 0x303   :  { %v537_v6 = vmul.f32 0.5, %v536_v1  ;;  %v1335_v14 = vadd.f32 %v3090_v3, %v1316_v32  ;;  %v1392_v2 = vadd.f32 %v3087_v22, %v1373_v37 }
 0x304   :  { %v3161_v12 = vadd.f32 %v3118_v10, %v572_v18  ;;  %v3170_v3 = vadd.f32 %v3118_v10, %v573_v30  ;;  %v509_v10 = vmul.f32 %v3137_v8, %v508_v34  ;;  %v3234_v18 = vld [vmem:[%s3391_s6 + $0x18] sm:$0xff] }
 0x305   :  { %v538_v33 = vsub.f32 1.5, %v537_v6  ;;  %v3164_v59 = vadd.f32 %v3094_v41, %v1335_v14  ;;  %v3167_v52 = vadd.f32 %v3096_v13, %v1392_v2  ;;  %v554_v35 = vpop.permute.xlu1 %553  ;;  %v3213_v6 = vld [vmem:[%s3391_s6] sm:$0xff]  ;;  %v3220_v14 = vld [vmem:[%s3391_s6 + $0x8] sm:$0xff]  ;;  %v3227_v2 = vld [vmem:[%s3391_s6 + $0x10] sm:$0xff] }
 0x306   :  { %v1430_v41 = vadd.f32 %v3170_v3, %v3161_v12  ;;  %v513_v38 = vsel %vm512_vm13, %v3137_v8, %v509_v10 }
 0x307   :  { %v539_v22 = vmul.f32 %v2262_v51, %v538_v33  ;;  %v1436_v19 = vadd.f32 %v3167_v52, %v3164_v59  ;;  %v544_v55 = vmul.f32 %v513_v38, %v492_v23  ;;  %v545_v48 = vmul.f32 %v513_v38, %v493_v36 }
 0x308   :  { %1431 = vadd.xlane.f32.xlu1 %v1430_v41 }
 0x309   :  { %v543_v13 = vsel %vm542_vm10, %v2262_v51, %v539_v22  ;;  %1437 = vadd.xlane.f32.xlu0 %v1436_v19  ;;  %v568_v45 = vmul.f32 %v554_v35, %v544_v55  ;;  %v569_v46 = vmul.f32 %v554_v35, %v545_v48 }
 0x30a   :  { %v550_v20 = vmul.f32 %v543_v13, %v498_v60  ;;  %v551_v16 = vmul.f32 %v543_v13, %v499_v21 }
 0x30c   :  { %v574_v15 = vmul.f32 %v3120_v29, %v550_v20  ;;  %v575_v57 = vmul.f32 %v3120_v29, %v551_v16 }
 0x30e   :  { %v3191_v27 = vadd.f32 %v3116_v61, %v574_v15  ;;  %v3194_v40 = vadd.f32 %v3116_v61, %v575_v57  ;;  %v578_v8 = vpop.permute.xlu1 %577 }
 0x30f   :  { %v3200_v26 = vadd.f32 %v578_v8, %v568_v45  ;;  %v3202_v17 = vadd.f32 %v578_v8, %v569_v46 }
 0x310   :  { %v1433_v29 = vadd.f32 %v3194_v40, %v3191_v27  ;;  %1440 = vadd.xlane.f32.xlu1 %v1439_v49 }
 0x311   :  { %v1424_v61 = vadd.f32 %v3202_v17, %v3200_v26 }
 0x312   :  { %1434 = vadd.xlane.f32.xlu2 %v1433_v29 }
 0x31a   :  { %1425 = vadd.xlane.f32.xlu2 %v1424_v61 }
 0x334   :  { %v1444_v28 = vpop.xlane.xlu2 %1443 }
 0x33c   :  { %v1447_v24 = vpop.xlane.xlu0 %1446 }
 0x373   :  { %v1429_v54 = vpop.xlane.xlu0 %1428 }
 0x37b   :  { %v1432_v51 = vpop.xlane.xlu1 %1431 }
 0x37c   :  { %v1450_v11 = vsel %vm801_vm1, %v1432_v51, %v1444_v28  ;;  %v1438_v32 = vpop.xlane.xlu0 %1437 }
 0x37d   :  { %v1454_v0 = vmul.f32 0.00390625, %v1450_v11 }
 0x383   :  { %v1441_v56 = vpop.xlane.xlu1 %1440 }
 0x384   :  { %v1449_v31 = vsel %vm801_vm1, %v1429_v54, %v1441_v56 }
 0x385   :  { %v1435_v58 = vpop.xlane.xlu2 %1434  ;;  %v1453_v1 = vmul.f32 0.00390625, %v1449_v31 }
 0x386   :  { %v1451_v53 = vsel %vm801_vm1, %v1435_v58, %v1447_v24 }
 0x387   :  { %v1455_v62 = vmul.f32 0.00390625, %v1451_v53 }
 0x389   :  { %1480 = vmatpush.msra.mxu2 %v1455_v62 }
 0x38b   :  { %1481 = vmatpush.msra.mxu2 %v1454_v0 }
 0x38d   :  { %v1426_v37 = vpop.xlane.xlu2 %1425  ;;  %1482 = vmatpush.msra.mxu2 %v1453_v1 }
 0x38e   :  { %v1448_v39 = vsel %vm801_vm1, %v1426_v37, %v1438_v32 }
 0x38f   :  { %v1452_v4 = vmul.f32 0.00390625, %v1448_v39 }
 0x391   :  { %1483 = vmatpush.msra.mxu2 %v1452_v4 }
 0x392   :  { %2092 = vmatmul.msk.f32.vlgmr.msra.gmra.mxu2 %vm153_vm0, %v3213_v6 }
 0x39a   :  { %2093 = vmatmul.msk.f32.gmra.mxu2 %vm153_vm0, %v3220_v14 }
 0x3a2   :  { %2094 = vmatmul.msk.f32.gmra.mxu2 %vm153_vm0, %v3227_v2 }
 0x3aa   :  { %2095 = vmatmul.msk.f32.gmra.mxu2 %vm153_vm0, %v3234_v18 }
 0x415   :  { %v1485_v34 = vpop.f32.mrf.mxu2 }
 0x416   :  { %v1497_v60 = vmul.f32 0.25, %v1485_v34 }
 0x418   :  { %v1501_v20 = vsub.f32 %v1452_v4, %v1497_v60 }
 0x41a   :  { %v1505_v38 = vmul.f32 1.442695, %v1501_v20 }
 0x41d   :  { %v1488_v30 = vpop.f32.mrf.mxu2 }
 0x41e   :  { %v1498_v35 = vmul.f32 0.25, %v1488_v30 }
 0x420   :  { %v1502_v13 = vsub.f32 %v1453_v1, %v1498_v35 }
 0x422   :  { %v1507_v57 = vmul.f32 1.442695, %v1502_v13 }
 0x425   :  { %v1491_v33 = vpop.f32.mrf.mxu2 }
 0x426   :  { %v1499_v22 = vmul.f32 0.25, %v1491_v33 }
 0x428   :  { %v1503_v21 = vsub.f32 %v1454_v0, %v1499_v22 }
 0x42a   :  { %v1509_v16 = vmul.f32 1.442695, %v1503_v21 }
 0x42d   :  { %v1494_v19 = vpop.f32.mrf.mxu2 }
 0x42e   :  { %v1500_v41 = vmul.f32 0.25, %v1494_v19 }
 0x430   :  { %v1504_v10 = vsub.f32 %v1455_v62, %v1500_v41 }
 0x432   :  { %v1511_v15 = vmul.f32 1.442695, %v1504_v10 }
 0x434   :  { %2263 = vpow2.f32 %v1511_v15 }
 0x435   :  { %2265 = vpow2.f32 %v1509_v16 }
 0x436   :  { %2267 = vpow2.f32 %v1507_v57 }
 0x437   :  { %2269 = vpow2.f32 %v1505_v38 }
 0x43a   :  { %v3238_v23 = vpop.eup %2263 }
 0x43b   :  { %1525 = vmatpush.msrb.mxu0 %v3238_v23  ;;  %v2266_v36 = vpop.eup %2265 }
 0x43c   :  { %v2268_v55 = vpop.eup %2267 }
 0x43d   :  { %1526 = vmatpush.msrb.mxu0 %v2266_v36  ;;  %v3241_v48 = vpop.eup %2269 }
 0x43f   :  { %1527 = vmatpush.msrb.mxu0 %v2268_v55 }
 0x441   :  { %1528 = vmatpush.msrb.mxu0 %v3241_v48 }
 0x442   :  { %2096 = vmatmul.msk.f32.vlgmr.msrb.gmra.mxu0 %vm153_vm0, %v3213_v6 }
 0x44a   :  { %2097 = vmatmul.msk.f32.gmra.mxu0 %vm153_vm0, %v3220_v14 }
 0x452   :  { %2098 = vmatmul.msk.f32.gmra.mxu0 %vm153_vm0, %v3227_v2 }
 0x45a   :  { %2099 = vmatmul.msk.f32.gmra.mxu0 %vm153_vm0, %v3234_v18 }
 0x4bf   :  { %v3252_v49 = vpop.f32.mrf.mxu0 }
 0x4c0   :  { %vm1547_vm12 = vweird.f32 %v3252_v49 }
 0x4c7   :  { %v1533_v29 = vpop.f32.mrf.mxu0 }
 0x4c8   :  { %2271 = vrcp.f32 %v1533_v29  ;;  %v1568_v28 = vand.u32 2147483648, %v1533_v29  ;;  %v1566_v51 = vand.u32 2147483647, %v1533_v29  ;;  %vm1562_vm14 = vweird.f32 %v1533_v29 }
 0x4ca   :  { %v1569_v58 = vor.u32 1.1754944e-38, %v1568_v28  ;;  %vm1567_vm7 = vcmp.eq.f32.partialorder %v1566_v51, 8.507059e+37 }
 0x4ce   :  { %v2272_v8 = vpop.eup %2271 }
 0x4cf   :  { %v1558_v45 = vmul.f32 %v2272_v8, %v1533_v29  ;;  %v1536_v46 = vpop.f32.mrf.mxu0  ;;  %vm1563_vm1 = vweird.f32 %v2272_v8 }
 0x4d0   :  { %2273 = vrcp.f32 %v1536_v46  ;;  %vm1564_vm15 = vmor %vm1562_vm14, %vm1563_vm1  ;;  %v1583_v32 = vand.u32 2147483648, %v1536_v46  ;;  %v1581_v4 = vand.u32 2147483647, %v1536_v46  ;;  %vm1577_vm3 = vweird.f32 %v1536_v46 }
 0x4d1   :  { %v1559_v61 = vsub.f32 1.0, %v1558_v45  ;;  %2275 = vrcp.f32 %v3252_v49 }
 0x4d2   :  { %v1584_v22 = vor.u32 1.1754944e-38, %v1583_v32  ;;  %vm1582_vm5 = vcmp.eq.f32.partialorder %v1581_v4, 8.507059e+37 }
 0x4d3   :  { %v1560_v24 = vmul.f32 %v2272_v8, %v1559_v61 }
 0x4d5   :  { %v1561_v54 = vadd.f32 %v2272_v8, %v1560_v24 }
 0x4d6   :  { %v2274_v56 = vpop.eup %2273 }
 0x4d7   :  { %v1573_v11 = vmul.f32 %v2274_v56, %v1536_v46  ;;  %v1539_v53 = vpop.f32.mrf.mxu0  ;;  %v1565_v62 = vsel %vm1564_vm15, %v2272_v8, %v1561_v54  ;;  %v2276_v31 = vpop.eup %2275  ;;  %vm1578_vm2 = vweird.f32 %v2274_v56  ;;  %v1551_v46 = vand.u32 2147483647, %v3252_v49 }
 0x4d8   :  { %2277 = vrcp.f32 %v1539_v53  ;;  %v1570_v1 = vsel %vm1567_vm7, %v1569_v58, %v1565_v62  ;;  %v1543_v34 = vmul.f32 %v2276_v31, %v3252_v49  ;;  %vm1579_vm4 = vmor %vm1577_vm3, %vm1578_vm2  ;;  %v1598_v10 = vand.u32 2147483648, %v1539_v53 }
 0x4d9   :  { %v1574_v0 = vsub.f32 1.0, %v1573_v11  ;;  %v1571_v37 = vmul.f32 %v2268_v55, %v1570_v1  ;;  %v1596_v16 = vand.u32 2147483647, %v1539_v53  ;;  %vm1592_vm8 = vweird.f32 %v1539_v53 }
 0x4da   :  { %v1544_v60 = vsub.f32 1.0, %v1543_v34  ;;  %v1599_v38 = vor.u32 1.1754944e-38, %v1598_v10  ;;  %vm1548_vm11 = vweird.f32 %v2276_v31  ;;  %vm1552_vm1 = vcmp.eq.f32.partialorder %v1551_v46, 8.507059e+37 }
 0x4db   :  { %v1575_v39 = vmul.f32 %v2274_v56, %v1574_v0  ;;  %1635 = vperm.xlu1 %2233, %v1571_v37   ;;  %1609 = vperm.xlu2 %2232, %v1571_v37   ;;  %vm1597_vm10 = vcmp.eq.f32.partialorder %v1596_v16, 8.507059e+37  ;;  %vm1549_vm13 = vmor %vm1547_vm12, %vm1548_vm11 }
 0x4dc   :  { %v1545_v15 = vmul.f32 %v2276_v31, %v1544_v60 }
 0x4dd   :  { %v1576_v30 = vadd.f32 %v2274_v56, %v1575_v39 }
 0x4de   :  { %v2278_v33 = vpop.eup %2277  ;;  %v1546_v8 = vadd.f32 %v2276_v31, %v1545_v15 }
 0x4df   :  { %v1588_v35 = vmul.f32 %v2278_v33, %v1539_v53  ;;  %v1580_v19 = vsel %vm1579_vm4, %v2274_v56, %v1576_v30  ;;  %vm1593_vm6 = vweird.f32 %v2278_v33 }
 0x4e0   :  { %v1585_v21 = vsel %vm1582_vm5, %v1584_v22, %v1580_v19  ;;  %vm1594_vm9 = vmor %vm1592_vm8, %vm1593_vm6  ;;  %v1550_v61 = vsel %vm1549_vm13, %v2276_v31, %v1546_v8 }
 0x4e1   :  { %v1589_v41 = vsub.f32 1.0, %v1588_v35  ;;  %v1586_v13 = vmul.f32 %v2266_v36, %v1585_v21  ;;  %v1553_v36 = vand.u32 2147483648, %v3252_v49 }
 0x4e3   :  { %v1590_v20 = vmul.f32 %v2278_v33, %v1589_v41  ;;  %1614 = vperm.xlu0 %2231, %v1586_v13   ;;  %1639 = vperm.xlu1 %2233, %v1586_v13   ;;  %v1554_v24 = vor.u32 1.1754944e-38, %v1553_v36 }
 0x4e4   :  { %2235 = vset.pattern.permute.xlu2 %v2341_v9 }
 0x4e5   :  { %v1591_v57 = vadd.f32 %v2278_v33, %v1590_v20  ;;  %v1555_v28 = vsel %vm1552_vm1, %v1554_v24, %v1550_v61 }
 0x4e6   :  { %v1556_v51 = vmul.f32 %v3241_v48, %v1555_v28 }
 0x4e7   :  { %v1595_v55 = vsel %vm1594_vm9, %v2278_v33, %v1591_v57 }
 0x4e8   :  { %v1600_v29 = vsel %vm1597_vm10, %v1599_v38, %v1595_v55 }
 0x4e9   :  { %v1601_v45 = vmul.f32 %v3238_v23, %v1600_v29 }
 0x4eb   :  { %1643 = vperm.xlu2 %2235, %v1601_v45   ;;  %2238 = vset.pattern.permute.xlu0 %v2341_v9 }
 0x4ec   :  { %2234 = vset.pattern.permute.xlu1 %v2333_v42 }
 0x4ed   :  { %1619 = vperm.xlu1 %2234, %v1601_v45  }
 0x4f3   :  { %2236 = vset.pattern.permute.xlu2 %v2333_v42 }
 0x4f4   :  { %1604 = vperm.xlu2 %2236, %v1556_v51  }
 0x4f5   :  { %2237 = vset.pattern.permute.xlu1 %v2341_v9 }
 0x4f6   :  { %1631 = vperm.xlu1 %2237, %v1556_v51  }
 0x535   :  { %v1610_v49 = vpop.permute.xlu2 %1609 }
 0x545   :  { %v1644_v56 = vpop.permute.xlu2 %1643 }
 0x546   :  { %v1652_v11 = vmul.f32 %v1644_v56, %v3191_v27  ;;  %v1653_v53 = vmul.f32 %v1644_v56, %v3194_v40  ;;  %v1624_v40 = vmul.f32 %v1610_v49, %v3098_v50 }
 0x54d   :  { %v1636_v23 = vpop.permute.xlu1 %1635 }
 0x54e   :  { %v1648_v32 = vmul.f32 %v1636_v23, %v3144_v25  ;;  %v1649_v37 = vmul.f32 %v1636_v23, %v3146_v5  ;;  %v1605_v34 = vpop.permute.xlu2 %1604 }
 0x54f   :  { %v1623_v25 = vmul.f32 %v1605_v34, %v3167_v52 }
 0x555   :  { %v1640_v54 = vpop.permute.xlu1 %1639  ;;  %v1615_v58 = vpop.permute.xlu0 %1614 }
 0x556   :  { %v1626_v62 = vmul.f32 %v1615_v58, %v3102_v44  ;;  %v1627_v31 = vmul.f32 %v1615_v58, %v3104_v47  ;;  %v1650_v42 = vmul.f32 %v1640_v54, %v3161_v12  ;;  %v1651_v0 = vmul.f32 %v1640_v54, %v3170_v3 }
 0x557   :  { %v1625_v44 = vmul.f32 %v1610_v49, %v3100_v63  ;;  %v1656_v12 = vadd.f32 %v1648_v32, %v1624_v40 }
 0x558   :  { %v1658_v47 = vadd.f32 %v1650_v42, %v1626_v62  ;;  %v1659_v4 = vadd.f32 %v1651_v0, %v1627_v31 }
 0x559   :  { %v1657_v3 = vadd.f32 %v1649_v37, %v1625_v44 }
 0x55f   :  { %v1620_v48 = vpop.permute.xlu1 %1619 }
 0x560   :  { %v1628_v9 = vmul.f32 %v1620_v48, %v3110_v7  ;;  %v1629_v1 = vmul.f32 %v1620_v48, %v3112_v43  ;;  %v1622_v43 = vmul.f32 %v1605_v34, %v3164_v59  ;;  %v2323_v48 = vld [vmem:[%s3386_s0] sm:$0xff] }
 0x562   :  { %v1660_v27 = vadd.f32 %v1652_v11, %v1628_v9  ;;  %v1661_v39 = vadd.f32 %v1653_v53, %v1629_v1 }
 0x564   :  { %1674 = vmatpush.msrb.mxu1 %v1660_v27  ;;  %1703 = vmatpush.msra.mxu3 %v1661_v39 }
 0x566   :  { %1675 = vmatpush.msrb.mxu1 %v1658_v47  ;;  %1704 = vmatpush.msra.mxu3 %v1659_v4 }
 0x568   :  { %1676 = vmatpush.msrb.mxu1 %v1656_v12  ;;  %1705 = vmatpush.msra.mxu3 %v1657_v3  ;;  %v1632_v7 = vpop.permute.xlu1 %1631 }
 0x569   :  { %v1646_v50 = vmul.f32 %v1632_v7, %v3200_v26  ;;  %v1647_v63 = vmul.f32 %v1632_v7, %v3202_v17 }
 0x56b   :  { %v1654_v5 = vadd.f32 %v1646_v50, %v1622_v43  ;;  %v1655_v30 = vadd.f32 %v1647_v63, %v1623_v25  ;;  %v2324_v50 = vld [vmem:[%s3386_s0 + $0x8] sm:$0xff] }
 0x56d   :  { %1677 = vmatpush.msrb.mxu1 %v1654_v5  ;;  %1706 = vmatpush.msra.mxu3 %v1655_v30 }
 0x56e   :  { %2104 = vmatmul.msk.f32.vlgmr.msra.gmra.mxu3 %vm153_vm0, %v3213_v6  ;;  %2100 = vmatmul.msk.f32.vlgmr.msrb.gmra.mxu1 %vm153_vm0, %v3213_v6 }
 0x576   :  { %2105 = vmatmul.msk.f32.gmra.mxu3 %vm153_vm0, %v3220_v14  ;;  %2101 = vmatmul.msk.f32.gmra.mxu1 %vm153_vm0, %v3220_v14 }
 0x57e   :  { %2106 = vmatmul.msk.f32.gmra.mxu3 %vm153_vm0, %v3227_v2  ;;  %2102 = vmatmul.msk.f32.gmra.mxu1 %vm153_vm0, %v3227_v2 }
 0x586   :  { %2107 = vmatmul.msk.f32.gmra.mxu3 %vm153_vm0, %v3234_v18  ;;  %2103 = vmatmul.msk.f32.gmra.mxu1 %vm153_vm0, %v3234_v18 }
 0x5eb   :  { %v1679_v59 = vpop.f32.mrf.mxu1 }
 0x5ec   :  { %v2108_v52 = vmul.f32 -1.442695, %v1679_v59 }
 0x5ee   :  { %2279 = vpow2.f32 %v2108_v52 }
 0x5f1   :  { %v1708_v26 = vpop.f32.mrf.mxu3 }
 0x5f2   :  { %v2109_v17 = vmul.f32 -1.442695, %v1708_v26 }
 0x5f3   :  { %v1682_v6 = vpop.f32.mrf.mxu1 }
 0x5f4   :  { %v2280_v33 = vpop.eup %2279  ;;  %2281 = vpow2.f32 %v2109_v17  ;;  %v2110_v14 = vmul.f32 -1.442695, %v1682_v6 }
 0x5f5   :  { %v1744_v22 = vadd.f32 1.0, %v2280_v33 }
 0x5f6   :  { %2283 = vpow2.f32 %v2110_v14 }
 0x5f7   :  { %2285 = vrcp.f32 %v1744_v22  ;;  %v1761_v15 = vand.u32 2147483647, %v1744_v22  ;;  %v1763_v57 = vand.u32 2147483648, %v1744_v22  ;;  %vm1757_vm0 = vweird.f32 %v1744_v22 }
 0x5f9   :  { %v1711_v35 = vpop.f32.mrf.mxu3  ;;  %vm1762_vm7 = vcmp.eq.f32.partialorder %v1761_v15, 8.507059e+37  ;;  %v1764_v51 = vor.u32 1.1754944e-38, %v1763_v57 }
 0x5fa   :  { %v2282_v2 = vpop.eup %2281  ;;  %v2111_v19 = vmul.f32 -1.442695, %v1711_v35 }
 0x5fb   :  { %v3298_v60 = vadd.f32 1.0, %v2282_v2  ;;  %v1685_v21 = vpop.f32.mrf.mxu1 }
 0x5fc   :  { %v2284_v41 = vpop.eup %2283  ;;  %2287 = vpow2.f32 %v2111_v19  ;;  %v2112_v18 = vmul.f32 -1.442695, %v1685_v21 }
 0x5fd   :  { %v2286_v13 = vpop.eup %2285  ;;  %2289 = vrcp.f32 %v3298_v60  ;;  %v3301_v20 = vadd.f32 1.0, %v2284_v41  ;;  %v1778_v23 = vand.u32 2147483648, %v3298_v60  ;;  %v1776_v62 = vand.u32 2147483647, %v3298_v60 }
 0x5fe   :  { %v1753_v10 = vmul.f32 %v2286_v13, %v1744_v22  ;;  %2291 = vpow2.f32 %v2112_v18  ;;  %vm1758_vm14 = vweird.f32 %v2286_v13  ;;  %vm1772_vm3 = vweird.f32 %v3298_v60  ;;  %v2325_v22 = vld [vmem:[%s3386_s0 + $0x10] sm:$0xff] }
 0x5ff   :  { %2293 = vrcp.f32 %v3301_v20  ;;  %vm1759_vm15 = vmor %vm1757_vm0, %vm1758_vm14  ;;  %v1779_v9 = vor.u32 1.1754944e-38, %v1778_v23  ;;  %vm1787_vm4 = vweird.f32 %v3301_v20  ;;  %v1793_v39 = vand.u32 2147483648, %v3301_v20 }
 0x600   :  { %v1754_v16 = vsub.f32 1.0, %v1753_v10  ;;  %v1791_v4 = vand.u32 2147483647, %v3301_v20  ;;  %vm1777_vm8 = vcmp.eq.f32.partialorder %v1776_v62, 8.507059e+37 }
 0x601   :  { %v1714_v38 = vpop.f32.mrf.mxu3  ;;  %v1794_v5 = vor.u32 1.1754944e-38, %v1793_v39 }
 0x602   :  { %v2288_v55 = vpop.eup %2287  ;;  %v1755_v29 = vmul.f32 %v2286_v13, %v1754_v16  ;;  %v2113_v8 = vmul.f32 -1.442695, %v1714_v38  ;;  %vm1792_vm10 = vcmp.eq.f32.partialorder %v1791_v4, 8.507059e+37 }
 0x603   :  { %v2290_v36 = vpop.eup %2289  ;;  %v3304_v45 = vadd.f32 1.0, %v2288_v55  ;;  %v1688_v46 = vpop.f32.mrf.mxu1 }
 0x604   :  { %v2292_v61 = vpop.eup %2291  ;;  %v1756_v24 = vadd.f32 %v2286_v13, %v1755_v29  ;;  %v1768_v28 = vmul.f32 %v2290_v36, %v3298_v60  ;;  %2295 = vpow2.f32 %v2113_v8  ;;  %v2114_v11 = vmul.f32 -1.442695, %v1688_v46  ;;  %v2326_v29 = vld [vmem:[%s3386_s0 + $0x18] sm:$0xff] }
 0x605   :  { %2297 = vrcp.f32 %v3304_v45  ;;  %v2294_v49 = vpop.eup %2293  ;;  %v3309_v58 = vadd.f32 1.0, %v2292_v61  ;;  %vm1773_vm2 = vweird.f32 %v2290_v36  ;;  %v1808_v59 = vand.u32 2147483648, %v3304_v45 }
 0x606   :  { %v1760_v54 = vsel %vm1759_vm15, %v2286_v13, %v1756_v24  ;;  %v1769_v56 = vsub.f32 1.0, %v1768_v28  ;;  %v1783_v31 = vmul.f32 %v2294_v49, %v3301_v20  ;;  %vm1774_vm5 = vmor %vm1772_vm3, %vm1773_vm2  ;;  %vm1788_vm6 = vweird.f32 %v2294_v49 }
 0x607   :  { %v1765_v53 = vsel %vm1762_vm7, %v1764_v51, %v1760_v54  ;;  %2299 = vrcp.f32 %v3309_v58  ;;  %vm1789_vm9 = vmor %vm1787_vm4, %vm1788_vm6  ;;  %v1806_v14 = vand.u32 2147483647, %v3304_v45  ;;  %vm1802_vm12 = vweird.f32 %v3304_v45 }
 0x608   :  { %v1872_v42 = vmul.f32 %v2323_v48, %v1765_v53  ;;  %v1770_v0 = vmul.f32 %v2290_v36, %v1769_v56  ;;  %v1784_v1 = vsub.f32 1.0, %v1783_v31  ;;  %2301 = vpow2.f32 %v2114_v11 }
 0x609   :  { %v1717_v32 = vpop.f32.mrf.mxu3  ;;  %v1809_v41 = vor.u32 1.1754944e-38, %v1808_v59  ;;  %vm1817_vm13 = vweird.f32 %v3309_v58  ;;  %v1823_v18 = vand.u32 2147483648, %v3309_v58  ;;  %v1821_v20 = vand.u32 2147483647, %v3309_v58 }
 0x60a   :  { %v2296_v37 = vpop.eup %2295  ;;  %1880 = vst [vmem:[%s3392_s7] sm:$0xff] %v1872_v42  ;;  %v1771_v27 = vadd.f32 %v2290_v36, %v1770_v0  ;;  %v2115_v40 = vmul.f32 -1.442695, %v1717_v32  ;;  %v1785_v47 = vmul.f32 %v2294_v49, %v1784_v1  ;;  %vm1807_vm14 = vcmp.eq.f32.partialorder %v1806_v14, 8.507059e+37 }
 0x60b   :  { %v2298_v44 = vpop.eup %2297  ;;  %v3324_v12 = vadd.f32 1.0, %v2296_v37  ;;  %vm1822_vm7 = vcmp.eq.f32.partialorder %v1821_v20, 8.507059e+37 }
 0x60c   :  { %v1775_v3 = vsel %vm1774_vm5, %v2290_v36, %v1771_v27  ;;  %v1798_v34 = vmul.f32 %v2298_v44, %v3304_v45  ;;  %2303 = vpow2.f32 %v2115_v40  ;;  %v1786_v43 = vadd.f32 %v2294_v49, %v1785_v47 }
 0x60d   :  { %v1780_v7 = vsel %vm1777_vm8, %v1779_v9, %v1775_v3  ;;  %2305 = vrcp.f32 %v3324_v12  ;;  %v2300_v25 = vpop.eup %2299  ;;  %vm1803_vm11 = vweird.f32 %v2298_v44  ;;  %v1824_v36 = vor.u32 1.1754944e-38, %v1823_v18  ;;  %v2328_v9 = vld [vmem:[%s3386_s0 + $0x28] sm:$0xff] }
 0x60e   :  { %v1873_v63 = vmul.f32 %v2324_v50, %v1780_v7  ;;  %v1799_v30 = vsub.f32 1.0, %v1798_v34  ;;  %v1790_v52 = vsel %vm1789_vm9, %v2294_v49, %v1786_v43  ;;  %v1813_v26 = vmul.f32 %v2300_v25, %v3309_v58  ;;  %v2302_v17 = vpop.eup %2301  ;;  %vm1804_vm1 = vmor %vm1802_vm12, %vm1803_vm11  ;;  %v2327_v49 = vld [vmem:[%s3386_s0 + $0x20] sm:$0xff]  ;;  %v2329_v34 = vld [vmem:[%s3386_s0 + $0x30] sm:$0xff] }
 0x60f   :  { %v1795_v6 = vsel %vm1792_vm10, %v1794_v5, %v1790_v52  ;;  %v1750_v19 = vadd.f32 1.0, %v2302_v17  ;;  %vm1818_vm0 = vweird.f32 %v2300_v25  ;;  %v1838_v61 = vand.u32 2147483648, %v3324_v12  ;;  %v2330_v5 = vld [vmem:[%s3386_s0 + $0x38] sm:$0xff] }
 0x610   :  { %1881 = vst [vmem:[%s3392_s7 + $0x8] sm:$0xff] %v1873_v63  ;;  %v1800_v33 = vmul.f32 %v2298_v44, %v1799_v30  ;;  %v1874_v35 = vmul.f32 %v2325_v22, %v1795_v6  ;;  %v1814_v2 = vsub.f32 1.0, %v1813_v26  ;;  %vm1819_vm15 = vmor %vm1817_vm13, %vm1818_vm0  ;;  %v1836_v51 = vand.u32 2147483647, %v3324_v12 }
 0x611   :  { %2307 = vrcp.f32 %v1750_v19  ;;  %vm1832_vm3 = vweird.f32 %v3324_v12  ;;  %v1839_v11 = vor.u32 1.1754944e-38, %v1838_v61  ;;  %vm1847_vm6 = vweird.f32 %v1750_v19 }
 0x612   :  { %v2304_v60 = vpop.eup %2303  ;;  %v1801_v21 = vadd.f32 %v2298_v44, %v1800_v33  ;;  %1882 = vst [vmem:[%s3392_s7 + $0x10] sm:$0xff] %v1874_v35  ;;  %v1815_v10 = vmul.f32 %v2300_v25, %v1814_v2  ;;  %vm1837_vm5 = vcmp.eq.f32.partialorder %v1836_v51, 8.507059e+37  ;;  %v1851_v42 = vand.u32 2147483647, %v1750_v19 }
 0x613   :  { %v2306_v13 = vpop.eup %2305  ;;  %v1751_v55 = vadd.f32 1.0, %v2304_v60  ;;  %v1853_v0 = vand.u32 2147483648, %v1750_v19 }
 0x614   :  { %v1805_v16 = vsel %vm1804_vm1, %v2298_v44, %v1801_v21  ;;  %v1828_v15 = vmul.f32 %v2306_v13, %v3324_v12  ;;  %v1816_v38 = vadd.f32 %v2300_v25, %v1815_v10  ;;  %vm1833_vm2 = vweird.f32 %v2306_v13 }
 0x615   :  { %v1810_v57 = vsel %vm1807_vm14, %v1809_v41, %v1805_v16  ;;  %2309 = vrcp.f32 %v1751_v55  ;;  %vm1834_vm4 = vmor %vm1832_vm3, %vm1833_vm2  ;;  %vm1852_vm10 = vcmp.eq.f32.partialorder %v1851_v42, 8.507059e+37  ;;  %v1854_v40 = vor.u32 1.1754944e-38, %v1853_v0 }
 0x616   :  { %v1875_v8 = vmul.f32 %v2326_v29, %v1810_v57  ;;  %v1829_v45 = vsub.f32 1.0, %v1828_v15  ;;  %v1820_v46 = vsel %vm1819_vm15, %v2300_v25, %v1816_v38  ;;  %v1868_v44 = vand.u32 2147483648, %v1751_v55 }
 0x617   :  { %v1825_v24 = vsel %vm1822_vm7, %v1824_v36, %v1820_v46  ;;  %v2308_v23 = vpop.eup %2307  ;;  %v1866_v12 = vand.u32 2147483647, %v1751_v55  ;;  %vm1862_vm12 = vweird.f32 %v1751_v55 }
 0x618   :  { %1883 = vst [vmem:[%s3392_s7 + $0x18] sm:$0xff] %v1875_v8  ;;  %v1830_v28 = vmul.f32 %v2306_v13, %v1829_v45  ;;  %v1876_v54 = vmul.f32 %v2327_v49, %v1825_v24  ;;  %v1843_v58 = vmul.f32 %v2308_v23, %v1750_v19  ;;  %vm1848_vm8 = vweird.f32 %v2308_v23 }
 0x619   :  { %vm1849_vm9 = vmor %vm1847_vm6, %vm1848_vm8  ;;  %v1869_v25 = vor.u32 1.1754944e-38, %v1868_v44  ;;  %vm1867_vm1 = vcmp.eq.f32.partialorder %v1866_v12, 8.507059e+37 }
 0x61a   :  { %v1831_v56 = vadd.f32 %v2306_v13, %v1830_v28  ;;  %1884 = vst [vmem:[%s3392_s7 + $0x20] sm:$0xff] %v1876_v54  ;;  %v1844_v62 = vsub.f32 1.0, %v1843_v58 }
 0x61b   :  { %v2310_v31 = vpop.eup %2309 }
 0x61c   :  { %v1835_v53 = vsel %vm1834_vm4, %v2306_v13, %v1831_v56  ;;  %v1845_v32 = vmul.f32 %v2308_v23, %v1844_v62  ;;  %v1858_v37 = vmul.f32 %v2310_v31, %v1751_v55  ;;  %vm1863_vm11 = vweird.f32 %v2310_v31 }
 0x61d   :  { %v1840_v48 = vsel %vm1837_vm5, %v1839_v11, %v1835_v53  ;;  %vm1864_vm13 = vmor %vm1862_vm12, %vm1863_vm11 }
 0x61e   :  { %v1877_v1 = vmul.f32 %v2328_v9, %v1840_v48  ;;  %v1846_v27 = vadd.f32 %v2308_v23, %v1845_v32  ;;  %v1859_v39 = vsub.f32 1.0, %v1858_v37 }
 0x620   :  { %1885 = vst [vmem:[%s3392_s7 + $0x28] sm:$0xff] %v1877_v1  ;;  %v1850_v47 = vsel %vm1849_vm9, %v2308_v23, %v1846_v27  ;;  %v1860_v4 = vmul.f32 %v2310_v31, %v1859_v39 }
 0x621   :  { %v1855_v3 = vsel %vm1852_vm10, %v1854_v40, %v1850_v47 }
 0x622   :  { %v1878_v7 = vmul.f32 %v2329_v34, %v1855_v3  ;;  %v1861_v43 = vadd.f32 %v2310_v31, %v1860_v4 }
 0x624   :  { %1886 = vst [vmem:[%s3392_s7 + $0x30] sm:$0xff] %v1878_v7  ;;  %v1865_v50 = vsel %vm1864_vm13, %v2310_v31, %v1861_v43 }
 0x625   :  { %v1870_v63 = vsel %vm1867_vm1, %v1869_v25, %v1865_v50 }
 0x626   :  { %v1879_v30 = vmul.f32 %v2330_v5, %v1870_v63 }
 0x628   :  { %1887 = vst [vmem:[%s3392_s7 + $0x38] sm:$0xff] %v1879_v30 }

</bundles_post_ra>
